<compile_context>
chip_gen: v7x
topology: tpu7x:2x2x1
jax: 0.10.0
libtpu: 0.0.40
codegen_flags: <defaults>
</compile_context>

<pallas_src>
import math

import jax
import jax.numpy as jnp
from jax.experimental import pallas as pl
from jax.experimental.pallas import tpu as pltpu


def _round_up(a, m):
    return ((a + m - 1) // m) * m


# ----------------------------------------------------------------------------
# Kernel
# ----------------------------------------------------------------------------
def _sine_layer_kernel(x_ref, w_ref, b_ref, o_ref):
    # x_ref: (tm, n_in), w_ref: (n_in, n_out_p), b_ref: (1, n_out_p),
    # o_ref: (tm, n_out_p).  omega_0 already folded into w_ref / b_ref.
    x = x_ref[...]
    w = w_ref[...]
    if x.dtype != w.dtype:            # optional bf16 MXU path (v6e/v7x)
        x = x.astype(w.dtype)
    z = jnp.dot(x, w, preferred_element_type=jnp.float32)
    z = z + b_ref[...].astype(jnp.float32)   # broadcast (1, n_out_p) over rows
    o_ref[...] = jnp.sin(z).astype(o_ref.dtype)


# ----------------------------------------------------------------------------
# Generation-aware sizing helpers
# ----------------------------------------------------------------------------
def _physical_vmem_bytes():
    try:
        return int(pltpu.get_tpu_info().vmem_capacity_bytes)
    except Exception:
        return 64 << 20   # conservative fallback (v7x per-TC VMEM)


def _has_two_tensorcores():
    # Only v7x has 2 TensorCores per chip; v5e/v6e have 1.
    try:
        kind = jax.devices()[0].device_kind.lower()
    except Exception:
        return False
    return "v7" in kind


def _vmem_bytes_needed(tm, n_in, n_out_p, x_itemsize=4, w_itemsize=4):
    # Double-buffered streaming x tile and output tile; weight/bias fetched
    # once (constant index_map) but conservatively counted x2.
    x_b = 2 * tm * max(n_in, 1) * x_itemsize
    o_b = 2 * tm * n_out_p * 4
    w_b = 2 * max(n_in, 1) * n_out_p * w_itemsize
    b_b = 2 * 8 * n_out_p * 4
    return x_b + o_b + w_b + b_b


def _choose_tm(b_p8, n_in, n_out_p, tm_max, want_even_grid, budget):
    """Largest batch tile that (a) divides the 8-padded batch, (b) fits VMEM,
    and (c) on v7x prefers an even grid-step count for TC balance."""
    cap = max(8, min(tm_max, b_p8))
    divs = [d for d in range(8, cap + 1, 8) if b_p8 % d == 0]
    if not divs:                      # unreachable: b_p8 is a multiple of 8
        divs = [8]
    fitting = [d for d in divs if _vmem_bytes_needed(d, n_in, n_out_p) <= budget]
    cand = fitting if fitting else [min(divs)]
    best = max(cand)
    if want_even_grid:
        even = [d for d in cand if (b_p8 // d) % 2 == 0]
        if even:
            best = max(even)
    return best


# ----------------------------------------------------------------------------
# One-time parameter prep (call once per layer, reuse across forwards)
# ----------------------------------------------------------------------------
def prepare_sine_layer_params(weight, bias, omega_0=30.0, *,
                              compute_dtype=jnp.float32):
    """Fold omega_0, transpose to (n_in, n_out), pad features to 128 lanes.

    weight: (n_out, n_in) PyTorch Linear layout, bias: (n_out,).
    Returns (w_prepared, b_prepared, n_out).
    """
    n_out, n_in = weight.shape
    omega = jnp.float32(omega_0)
    w_t = (omega * weight.astype(jnp.float32)).T            # (n_in, n_out)
    b_s = (omega * bias.astype(jnp.float32)).reshape(1, n_out)

    n_out_p = _round_up(max(n_out, 128), 128)                # lane-dense out
    if n_out_p != n_out:
        w_t = jnp.pad(w_t, ((0, 0), (0, n_out_p - n_out)))
        b_s = jnp.pad(b_s, ((0, 0), (0, n_out_p - n_out)))
    return w_t.astype(compute_dtype), b_s, n_out


# ----------------------------------------------------------------------------
# Forward (hot path) — params already prepared
# ----------------------------------------------------------------------------
def sine_layer_forward_prepared(x, w_prepared, b_prepared, n_out, *,
                                tm_max=2048):
    """y = sin(x @ w_prepared + b_prepared)[:, :n_out].  x: (B, n_in) f32."""
    B, n_in = x.shape
    n_in_w, n_out_p = w_prepared.shape
    assert n_in == n_in_w, "x / weight feature mismatch"

    b_p8 = _round_up(max(B, 8), 8)

    phys = _physical_vmem_bytes()
    budget = max(phys - (8 << 20), 16 << 20)       # leave headroom
    tm = _choose_tm(b_p8, n_in, n_out_p, tm_max,
                    _has_two_tensorcores(), budget)

    if b_p8 != B:
        x = jnp.pad(x, ((0, b_p8 - B), (0, 0)))

    needed = _vmem_bytes_needed(
        tm, n_in, n_out_p,
        jnp.dtype(x.dtype).itemsize, jnp.dtype(w_prepared.dtype).itemsize)
    vmem_limit = int(min(budget, max(needed + (4 << 20), 32 << 20)))

    grid = (b_p8 // tm,)

    out = pl.pallas_call(
        _sine_layer_kernel,
        out_shape=jax.ShapeDtypeStruct((b_p8, n_out_p), x.dtype),
        grid_spec=pl.GridSpec(
            grid=grid,
            in_specs=[
                pl.BlockSpec((tm, n_in), lambda i: (i, 0)),        # x tile
                pl.BlockSpec((n_in, n_out_p), lambda i: (0, 0)),   # weight, resident
                pl.BlockSpec((1, n_out_p), lambda i: (0, 0)),      # bias, resident
            ],
            out_specs=pl.BlockSpec((tm, n_out_p), lambda i: (i, 0)),
        ),
        compiler_params=pltpu.CompilerParams(
            dimension_semantics=("parallel",),
            vmem_limit_bytes=vmem_limit,
        ),
    )(x, w_prepared, b_prepared)

    if b_p8 != B or n_out_p != n_out:
        out = out[:B, :n_out]          # only pays a copy on unaligned shapes
    return out


def sine_layer_forward(x, weight, bias, omega_0=30.0, *, tm_max=2048,
                       compute_dtype=jnp.float32):
    """Convenience wrapper matching the original signature (prep + forward)."""
    w_p, b_p, n_out = prepare_sine_layer_params(
        weight, bias, omega_0, compute_dtype=compute_dtype)
    return sine_layer_forward_prepared(x, w_p, b_p, n_out, tm_max=tm_max)


# ----------------------------------------------------------------------------
# Init matching the PyTorch module
# ----------------------------------------------------------------------------
def init_sine_layer_params(key, n_in, n_out, is_first=False, omega_0=30.0):
    """Deterministic init matching the PyTorch module's __init__ semantics."""
    k_w, k_b = jax.random.split(key)
    if is_first:
        w_bound = 1.0 / n_in
    else:
        w_bound = math.sqrt(6.0 / n_in) / omega_0
    weight = jax.random.uniform(
        k_w, (n_out, n_in), dtype=jnp.float32, minval=-w_bound, maxval=w_bound)
    # torch.nn.Linear default bias init: U(-1/sqrt(n_in), 1/sqrt(n_in))
    b_bound = 1.0 / math.sqrt(n_in)
    bias = jax.random.uniform(
        k_b, (n_out,), dtype=jnp.float32, minval=-b_bound, maxval=b_bound)
    return weight, bias


if __name__ == "__main__":
    key = jax.random.PRNGKey(0)
    omega_0 = 30.0

    # Case 1: aligned shapes -> fast path (no pad, no post-kernel slice copy),
    #         tiny-K first layer like a real SIREN (coords in, 128 features).
    # Case 2: unaligned B and n_out -> exercises the padding / slice path.
    cases = [
        (128, 3, 128, True),
        (100, 32, 32, False),
    ]

    for idx, (B, n_in, n_out, is_first) in enumerate(cases):
        k_x, k_p, key = jax.random.split(key, 3)
        x = jax.random.normal(k_x, (B, n_in), dtype=jnp.float32)
        weight, bias = init_sine_layer_params(k_p, n_in, n_out, is_first, omega_0)

        # One-time prep, then the hot-path forward.
        w_p, b_p, n_out_eff = prepare_sine_layer_params(weight, bias, omega_0)
        y = sine_layer_forward_prepared(x, w_p, b_p, n_out_eff)
        y = jax.block_until_ready(y)

        # Pure-JAX reference of the forward semantics.
        y_ref = jnp.sin(omega_0 * (x @ weight.T + bias))
        assert y.shape == (B, n_out), f"shape mismatch case {idx}"
        assert jnp.allclose(y, y_ref, atol=2e-4, rtol=2e-4), \
            f"mismatch vs reference, case {idx}"

    print("KERNEL_OK")
</pallas_src>

<mosaic_0001>
module attributes {stable_mosaic.version = 11 : i64} {
  func.func @_sine_layer_kernel(%arg0: i32, %arg1: memref<128x3xf32, #tpu.memory_space<vmem>>, %arg2: memref<3x128xf32, #tpu.memory_space<vmem>>, %arg3: memref<1x128xf32, #tpu.memory_space<vmem>>, %arg4: memref<128x128xf32, #tpu.memory_space<vmem>>) attributes {dimension_semantics = [#tpu.dimension_semantics<parallel>], iteration_bounds = array<i64: 1>, scalar_prefetch = 0 : i64, scratch_operands = 0 : i64, tpu.core_type = #tpu.core_type<tc>, window_params = [{transform_indices = @transform_0, window_bounds = array<i64: 128, 3>}, {pipeline_mode = #tpu.pipeline_mode<synchronous>, transform_indices = @transform_1, window_bounds = array<i64: 3, 128>}, {pipeline_mode = #tpu.pipeline_mode<synchronous>, transform_indices = @transform_2, window_bounds = array<i64: 1, 128>}, {transform_indices = @transform_3, window_bounds = array<i64: 128, 128>}]} {
    %c0 = arith.constant 0 : index
    %c0_0 = arith.constant 0 : index
    %0 = vector.load %arg1[%c0, %c0_0] : memref<128x3xf32, #tpu.memory_space<vmem>>, vector<128x3xf32>
    %c0_1 = arith.constant 0 : index
    %c0_2 = arith.constant 0 : index
    %1 = vector.load %arg2[%c0_1, %c0_2] : memref<3x128xf32, #tpu.memory_space<vmem>>, vector<3x128xf32>
    %cst = arith.constant dense<0.000000e+00> : vector<128x128xf32>
    %2 = tpu.matmul %0, %1, %cst {dimension_numbers = #tpu.dot_dimension_numbers<[1], [0], [0], [1], [0, 0, 1, 1], [], []>} : vector<128x3xf32>, vector<3x128xf32>, vector<128x128xf32> -> vector<128x128xf32>
    %c0_3 = arith.constant 0 : index
    %c0_4 = arith.constant 0 : index
    %3 = vector.load %arg3[%c0_3, %c0_4] : memref<1x128xf32, #tpu.memory_space<vmem>>, vector<1x128xf32>
    %4 = vector.broadcast %3 : vector<1x128xf32> to vector<128x128xf32>
    %5 = arith.addf %2, %4 : vector<128x128xf32>
    %6 = math.sin %5 : vector<128x128xf32>
    %c0_5 = arith.constant 0 : index
    %c0_6 = arith.constant 0 : index
    %7 = vector.load %arg4[%c0_5, %c0_6] : memref<128x128xf32, #tpu.memory_space<vmem>>, vector<128x128xf32>
    tpu.vector_store %arg4[%c0_5, %c0_6], %6 {strides = array<i32>} : memref<128x128xf32, #tpu.memory_space<vmem>>, vector<128x128xf32>,
    return
  }
  func.func @transform_0(%arg0: i32) -> (i32, i32) {
    %c0_i32 = arith.constant 0 : i32
    %c0_i32_0 = arith.constant 0 : i32
    return %arg0, %c0_i32 : i32, i32
  }
  func.func @transform_1(%arg0: i32) -> (i32, i32) {
    %c0_i32 = arith.constant 0 : i32
    %c0_i32_0 = arith.constant 0 : i32
    %c0_i32_1 = arith.constant 0 : i32
    return %c0_i32, %c0_i32_0 : i32, i32
  }
  func.func @transform_2(%arg0: i32) -> (i32, i32) {
    %c0_i32 = arith.constant 0 : i32
    %c0_i32_0 = arith.constant 0 : i32
    %c0_i32_1 = arith.constant 0 : i32
    return %c0_i32, %c0_i32_0 : i32, i32
  }
  func.func @transform_3(%arg0: i32) -> (i32, i32) {
    %c0_i32 = arith.constant 0 : i32
    %c0_i32_0 = arith.constant 0 : i32
    return %arg0, %c0_i32 : i32, i32
  }
}

</mosaic_0001>

<bundles_post_ra>
// kernel: tpu_custom_call.1
= control target key start
LH: loop header
LB: loop body
LE: loop exit
PB: predicated region body
PF: predicated region fallthrough
CT: control target
= control target key end

     0   :  { %vm88_vm0 = vcmask 1042432   ;;  %vm39_vm1 = vcmask 23552   ;;  %s3633_s0 = inlined_call_operand.vmem [shape: f32[128,3], index: 0, kind: input, shape index: {}]   ;;  %s3634_s1 = inlined_call_operand.vmem [shape: f32[3,128], index: 1, kind: input, shape index: {}]   ;;  %s3635_s2 = inlined_call_operand.vmem [shape: f32[1,128], index: 2, kind: input, shape index: {}]   ;;  %s3636_s3 = inlined_call_operand.hbm [shape: f32[128,128], index: 3, kind: output, shape index: {}]  }
   0x1   :  { %v31_v0 = vld [vmem:[%s3634_s1] sm:$0x7]  ;;  %v16_v3 = vld [vmem:[%s3633_s0 + $0x8] sm:$0xff]  ;;  %v17_v5 = vld [vmem:[%s3633_s0 + $0x10] sm:$0xff] }
   0x2   :  { %v15_v1 = vld [vmem:[%s3633_s0] sm:$0xff]  ;;  %2032 = vmatprep.subr.msk.mxu0 %vm88_vm0, %v31_v0  ;;  %2058 = vmatprep.subr.msk.mxu1 %vm88_vm0, %v31_v0  ;;  %v24_v4 = vld [vmem:[%s3633_s0 + $0x48] sm:$0xff]  ;;  %v25_v6 = vld [vmem:[%s3633_s0 + $0x50] sm:$0xff] }
   0x3   :  { %v23_v2 = vld [vmem:[%s3633_s0 + $0x40] sm:$0xff]  ;;  %2033 = vmatpush3.msk.msra.mxu0 %vm88_vm0, %v31_v0  ;;  %2059 = vmatpush3.msk.msra.mxu1 %vm88_vm0, %v31_v0  ;;  %v18_v7 = vld [vmem:[%s3633_s0 + $0x18] sm:$0xff] }
   0x4   :  { %2034 = vmatprep.mubr.msk.f32.mxu0 %vm39_vm1, %v15_v1  ;;  %2046 = vmatprep.mubr.msk.f32.mxu1 %vm39_vm1, %v23_v2  ;;  %v26_v8 = vld [vmem:[%s3633_s0 + $0x58] sm:$0xff] }
   0x5   :  { %2035 = vmatmul.mubr.msk.f32.vlgmr.msra.gmra.mrb[0].mxu0 %vm39_vm1, %v16_v3  ;;  %2047 = vmatmul.mubr.msk.f32.vlgmr.msra.gmra.mrb[0].mxu1 %vm39_vm1, %v24_v4 }
   0x6   :  { %2037 = vmatprep.mubr.msk.f32.mxu0 %vm39_vm1, %v17_v5  ;;  %2049 = vmatprep.mubr.msk.f32.mxu1 %vm39_vm1, %v25_v6 }
   0x7   :  { %8 = vsyncpa [#allocation3], 0  ;;  %v19_v9 = vld [vmem:[%s3633_s0 + $0x20] sm:$0xff]  ;;  %v20_v11 = vld [vmem:[%s3633_s0 + $0x28] sm:$0xff]  ;;  %v2223_v58 = vmov 683565275  }
   0x8   :  { %v27_v10 = vld [vmem:[%s3633_s0 + $0x60] sm:$0xff]  ;;  %v28_v12 = vld [vmem:[%s3633_s0 + $0x68] sm:$0xff]  ;;  %v21_v13 = vld [vmem:[%s3633_s0 + $0x30] sm:$0xff]  ;;  %v2224_v62 = vmov 2475754826  }
   0x9   :  { %2038 = vmatmul.mubr.msk.f32.gmra.mrb[2].mxu0 %vm39_vm1, %v18_v7  ;;  %2050 = vmatmul.mubr.msk.f32.gmra.mrb[2].mxu1 %vm39_vm1, %v26_v8  ;;  %v29_v14 = vld [vmem:[%s3633_s0 + $0x70] sm:$0xff]  ;;  %v22_v15 = vld [vmem:[%s3633_s0 + $0x38] sm:$0xff]  ;;  %v2322_v17 = vld [vmem:[%s3635_s2] ss:$0 sm:$0xff]  ;;  %v2225_v0 = vmov 2131351028  }
   0xa   :  { %2040 = vmatprep.mubr.msk.f32.mxu0 %vm39_vm1, %v19_v9  ;;  %2052 = vmatprep.mubr.msk.f32.mxu1 %vm39_vm1, %v27_v10  ;;  %v30_v16 = vld [vmem:[%s3633_s0 + $0x78] sm:$0xff]  ;;  %v2226_v2 = vmov 2102212464   ;;  %v2227_v4 = vmov 920167782  }
   0xd   :  { %2041 = vmatmul.mubr.msk.f32.gmra.mrb[4].mxu0 %vm39_vm1, %v20_v11  ;;  %2053 = vmatmul.mubr.msk.f32.gmra.mrb[4].mxu1 %vm39_vm1, %v28_v12  ;;  %v2228_v11 = vmov 1326507024  }
   0xe   :  { %2043 = vmatprep.mubr.msk.f32.mxu0 %vm39_vm1, %v21_v13  ;;  %2055 = vmatprep.mubr.msk.f32.mxu1 %vm39_vm1, %v29_v14 }
  0x11   :  { %2044 = vmatmul.mubr.msk.f32.gmra.mrb[6].mxu0 %vm39_vm1, %v22_v15  ;;  %2056 = vmatmul.mubr.msk.f32.gmra.mrb[6].mxu1 %vm39_vm1, %v30_v16 }
  0xd8   :  { %v2036_v18 = vpop.f32.mrb[0].mxu0  ;;  %v2048_v19 = vpop.f32.mrb[0].mxu1 }
  0xd9   :  { %v2325_v20 = vadd.f32 %v2036_v18, %v2322_v17  ;;  %v2328_v21 = vadd.f32 %v2048_v19, %v2322_v17  ;;  %v158_v22 = vpop.f32.mrb[1].mxu0  ;;  %v198_v23 = vpop.f32.mrb[1].mxu1 }
  0xda   :  { %v2331_v24 = vadd.f32 %v2322_v17, %v158_v22  ;;  %v2349_v42 = vadd.f32 %v2322_v17, %v198_v23 }
  0xdb   :  { %v341_v25 = vand.u32 2147483647, %v2325_v20  ;;  %v344_v26 = vand.u32 2139095040, %v2325_v20  ;;  %v1173_v27 = vand.u32 2147483647, %v2328_v21  ;;  %v1176_v28 = vand.u32 2139095040, %v2328_v21 }
  0xdc   :  { %v2337_v29 = vpop.f32.mrb[2].mxu0  ;;  %v2339_v30 = vpop.f32.mrb[2].mxu1  ;;  %v240_v35 = vand.u32 2139095040, %v2331_v24  ;;  %v237_v45 = vand.u32 2147483647, %v2331_v24  ;;  %v1072_v56 = vand.u32 2139095040, %v2349_v42 }
  0xdd   :  { %v345_v31 = vshrl.u32 %v344_v26, 23  ;;  %v348_v32 = vand.u32 8388607, %v341_v25  ;;  %v1177_v33 = vshrl.u32 %v1176_v28, 23  ;;  %v1180_v34 = vand.u32 8388607, %v1173_v27 }
  0xde   :  { %v2346_v37 = vpop.f32.mrb[3].mxu0  ;;  %v241_v39 = vshrl.u32 %v240_v35, 23  ;;  %v2352_v47 = vpop.f32.mrb[3].mxu1  ;;  %v2360_v54 = vand.u32 8388607, %v237_v45  ;;  %vm343_vm15 = vcmp.lt.s32.totalorder %v2325_v20, 0 }
  0xdf   :  { %v1955_v36 = vadd.s32 4294967169, %v345_v31  ;;  %v1987_v38 = vadd.s32 4294967169, %v1177_v33  ;;  %v349_v40 = vor.u32 8388608, %v348_v32  ;;  %v1181_v43 = vor.u32 8388608, %v1180_v34 }
  0xe0   :  { %v1951_v46 = vadd.s32 4294967169, %v241_v39  ;;  %vm2452_vm0 = vcmp.le.f32.partialorder %v341_v25, 0.7853982 }
  0xe1   :  { %v351_v41 = vadd.s32 1, %v1955_v36  ;;  %v1183_v44 = vadd.s32 1, %v1987_v38  ;;  %v2354_v51 = vshll.u32 %v349_v40, 8  ;;  %v2356_v53 = vshll.u32 %v1181_v43, 8 }
  0xe2   :  { %v2362_v55 = vadd.s32 1, %v1951_v46 }
  0xe3   :  { %vm352_vm2 = vcmp.gt.s32.totalorder %v351_v41, 0  ;;  %vm1184_vm3 = vcmp.gt.s32.totalorder %v1183_v44, 0 }
  0xe4   :  { %v353_v48 = vsel %vm352_vm2, %v351_v41, 0  ;;  %v1185_v52 = vsel %vm1184_vm3, %v1183_v44, 0  ;;  %vm248_vm8 = vcmp.gt.s32.totalorder %v2362_v55, 0 }
  0xe5   :  { %v354_v49 = vshrl.u32 %v353_v48, 5  ;;  %v355_v50 = vand.u32 31, %v353_v48  ;;  %v2366_v60 = vshrl.u32 %v1185_v52, 5  ;;  %v1187_v61 = vand.u32 31, %v1185_v52 }
  0xe7   :  { %v356_v57 = vsub.s32 32, %v355_v50  ;;  %v358_v59 = vshll.u32 %v2223_v58, %v355_v50  ;;  %v361_v63 = vshll.u32 %v2224_v62, %v355_v50  ;;  %v364_v1 = vshll.u32 %v2225_v0, %v355_v50 }
  0xe8   :  { %v367_v3 = vshll.u32 %v2226_v2, %v355_v50  ;;  %v370_v5 = vshll.u32 %v2227_v4, %v355_v50  ;;  %vm373_vm4 = vcmp.lt.s32.totalorder %v354_v49, 1  ;;  %vm374_vm5 = vcmp.lt.s32.totalorder %v354_v49, 2 }
  0xe9   :  { %v359_v6 = vshrl.u32 %v2224_v62, %v356_v57  ;;  %v362_v7 = vshrl.u32 %v2225_v0, %v356_v57  ;;  %v365_v8 = vshrl.u32 %v2226_v2, %v356_v57  ;;  %v357_v9 = vshrl.u32 %v2223_v58, %v356_v57 }
  0xea   :  { %v368_v10 = vshrl.u32 %v2227_v4, %v356_v57  ;;  %v371_v12 = vshrl.u32 %v2228_v11, %v356_v57  ;;  %v1188_v16 = vsub.s32 32, %v1187_v61  ;;  %vm375_vm6 = vcmp.lt.s32.totalorder %v354_v49, 3 }
  0xeb   :  { %v360_v13 = vor.u32 %v359_v6, %v358_v59  ;;  %v363_v14 = vor.u32 %v362_v7, %v361_v63  ;;  %v366_v15 = vor.u32 %v365_v8, %v364_v1  ;;  %vm376_vm7 = vcmp.lt.s32.totalorder %v354_v49, 4 }
  0xec   :  { %v369_v18 = vor.u32 %v368_v10, %v367_v3  ;;  %v372_v19 = vor.u32 %v371_v12, %v370_v5  ;;  %v1190_v34 = vshll.u32 %v2223_v58, %v1187_v61  ;;  %v1191_v38 = vshrl.u32 %v2224_v62, %v1188_v16 }
  0xed   :  { %v377_v22 = vsel %vm373_vm4, %v357_v9, %v360_v13  ;;  %v378_v23 = vsel %vm376_vm7, %v366_v15, 2102212464  ;;  %v381_v26 = vsel %vm373_vm4, %v360_v13, %v363_v14  ;;  %v385_v28 = vsel %vm373_vm4, %v363_v14, %v366_v15 }
  0xee   :  { %v379_v31 = vsel %vm375_vm6, %v363_v14, %v378_v23  ;;  %v382_v32 = vsel %vm376_vm7, %v369_v18, 920167782  ;;  %v386_v33 = vsel %vm376_vm7, %v372_v19, 1326507024  ;;  %v1193_v39 = vshll.u32 %v2224_v62, %v1187_v61 }
  0xef   :  { %v383_v35 = vsel %vm375_vm6, %v366_v15, %v382_v32  ;;  %v387_v36 = vsel %vm375_vm6, %v369_v18, %v386_v33  ;;  %v380_v40 = vsel %vm374_vm5, %v377_v22, %v379_v31  ;;  %v1194_v44 = vshrl.u32 %v2225_v0, %v1188_v16 }
  0xf0   :  { %v384_v41 = vsel %vm374_vm5, %v381_v26, %v383_v35  ;;  %v388_v43 = vsel %vm374_vm5, %v385_v28, %v387_v36  ;;  %v1192_v57 = vor.u32 %v1191_v38, %v1190_v34  ;;  %v1196_v63 = vshll.u32 %v2225_v0, %v1187_v61 }
  0xf1   :  { %v2390_v46 = vmul.u32.u64.low %v2354_v51, %v388_v43  ;;  %v2391_v48 = vmul.u32.u64.high %v2354_v51, %v388_v43, %v2390_v46  ;;  %v2394_v50 = vmul.u32.u64.low %v2354_v51, %v384_v41  ;;  %v2395_v52 = vmul.u32.u64.high %v2354_v51, %v384_v41, %v2394_v50 }
  0xf2   :  { %v1195_v59 = vor.u32 %v1194_v44, %v1193_v39  ;;  %v1197_v1 = vshrl.u32 %v2226_v2, %v1188_v16  ;;  %v1189_v3 = vshrl.u32 %v2223_v58, %v1188_v16  ;;  %v1199_v49 = vshll.u32 %v2226_v2, %v1187_v61 }
  0xf3   :  { %v1200_v5 = vshrl.u32 %v2227_v4, %v1188_v16  ;;  %v1203_v6 = vshrl.u32 %v2228_v11, %v1188_v16  ;;  %v396_v7 = vmul.u32 %v2354_v51, %v380_v40  ;;  %v1202_v9 = vshll.u32 %v2227_v4, %v1187_v61 }
  0xf4   :  { %v1198_v8 = vor.u32 %v1197_v1, %v1196_v63  ;;  %vm1205_vm9 = vcmp.lt.s32.totalorder %v2366_v60, 1  ;;  %vm398_vm10 = vc.u32 %v2391_v48, %v2394_v50  ;;  %v399_v10 = vadd.s32 1, %v2395_v52  ;;  %v2435_v63 = vpop.f32.mrb[4].mxu0 }
  0xf5   :  { %v1201_v12 = vor.u32 %v1200_v5, %v1199_v49  ;;  %vm1206_vm11 = vcmp.lt.s32.totalorder %v2366_v60, 2  ;;  %v1204_v13 = vor.u32 %v1203_v6, %v1202_v9  ;;  %vm1207_vm12 = vcmp.lt.s32.totalorder %v2366_v60, 3 }
  0xf6   :  { %vm1208_vm13 = vcmp.lt.s32.totalorder %v2366_v60, 4  ;;  %v1213_v14 = vsel %vm1205_vm9, %v1192_v57, %v1195_v59  ;;  %v400_v51 = vsel %vm398_vm10, %v399_v10, %v2395_v52  ;;  %v1217_v61 = vsel %vm1205_vm9, %v1195_v59, %v1198_v8 }
  0xf7   :  { %v1210_v15 = vsel %vm1208_vm13, %v1198_v8, 2102212464  ;;  %v1214_v16 = vsel %vm1208_vm13, %v1201_v12, 920167782  ;;  %v401_v18 = vadd.s32 %v400_v51, %v396_v7  ;;  %v1209_v19 = vsel %vm1205_vm9, %v1189_v3, %v1192_v57 }
  0xf8   :  { %v1215_v22 = vsel %vm1207_vm12, %v1198_v8, %v1214_v16  ;;  %v1218_v23 = vsel %vm1208_vm13, %v1204_v13, 1326507024  ;;  %v1211_v26 = vsel %vm1207_vm12, %v1195_v59, %v1210_v15  ;;  %v249_v32 = vsel %vm248_vm8, %v2362_v55, 0 }
  0xf9   :  { %v1216_v28 = vsel %vm1206_vm11, %v1213_v14, %v1215_v22  ;;  %v1219_v31 = vsel %vm1207_vm12, %v1201_v12, %v1218_v23  ;;  %v402_v33 = vadd.s32 536870912, %v401_v18  ;;  %v1069_v40 = vand.u32 2147483647, %v2349_v42 }
  0xfa   :  { %v1220_v34 = vsel %vm1206_vm11, %v1217_v61, %v1219_v31  ;;  %v2420_v35 = vmul.u32.u64.low %v2356_v53, %v1216_v28  ;;  %v2421_v36 = vmul.u32.u64.high %v2356_v53, %v1216_v28, %v2420_v35  ;;  %v1212_v43 = vsel %vm1206_vm11, %v1209_v19, %v1211_v26 }
  0xfb   :  { %v2425_v38 = vmul.u32.u64.low %v2356_v53, %v1220_v34  ;;  %v2426_v39 = vmul.u32.u64.high %v2356_v53, %v1220_v34, %v2425_v38  ;;  %v403_v41 = vshrl.u32 %v402_v33, 30  ;;  %v245_v55 = vor.u32 8388608, %v2360_v54 }
  0xfc   :  { %v251_v44 = vand.u32 31, %v249_v32  ;;  %v1231_v52 = vadd.s32 1, %v2421_v36  ;;  %v1073_v59 = vshrl.u32 %v1072_v56, 23  ;;  %v1228_v1 = vmul.u32 %v2356_v53, %v1212_v43 }
  0xfd   :  { %v404_v46 = vshll.u32 %v403_v41, 30  ;;  %vm1230_vm14 = vc.u32 %v2426_v39, %v2420_v35  ;;  %v2442_v60 = vand.u32 8388607, %v1069_v40  ;;  %v2448_v49 = vshll.u32 %v245_v55, 8 }
  0xfe   :  { %v252_v57 = vsub.s32 32, %v251_v44  ;;  %v1232_v3 = vsel %vm1230_vm14, %v1231_v52, %v2421_v36  ;;  %v397_v53 = vadd.s32 %v2394_v50, %v2391_v48  ;;  %v2457_v6 = vshrl.u32 %v249_v32, 5 }
  0xff   :  { %v2445_v54 = vsub.s32 %v401_v18, %v404_v46  ;;  %v1233_v5 = vadd.s32 %v1232_v3, %v1228_v1  ;;  %v1983_v12 = vadd.s32 4294967169, %v1073_v59  ;;  %v427_v13 = vsub.s32 4, %v403_v41 }
 0x100   :  { %v255_v7 = vshrl.u32 %v2224_v62, %v252_v57  ;;  %v258_v9 = vshrl.u32 %v2225_v0, %v252_v57  ;;  %v261_v10 = vshrl.u32 %v2226_v2, %v252_v57  ;;  %v254_v25 = vshll.u32 %v2223_v58, %v251_v44 }
 0x101   :  { %v407_v8 = vsub.s32 0, %v2445_v54  ;;  %v1234_v14 = vadd.s32 536870912, %v1233_v5  ;;  %v1077_v51 = vor.u32 8388608, %v2442_v60  ;;  %v257_v50 = vshll.u32 %v2224_v62, %v251_v44 }
 0x102   :  { %v260_v15 = vshll.u32 %v2225_v0, %v251_v44  ;;  %v264_v16 = vshrl.u32 %v2227_v4, %v252_v57  ;;  %v256_v18 = vor.u32 %v255_v7, %v254_v25  ;;  %v263_v19 = vshll.u32 %v2226_v2, %v251_v44 }
 0x103   :  { %v1956_v48 = vmin.u32 %v407_v8, %v2445_v54  ;;  %v1235_v61 = vshrl.u32 %v1234_v14, 30  ;;  %v267_v22 = vshrl.u32 %v2228_v11, %v252_v57  ;;  %v259_v26 = vor.u32 %v258_v9, %v257_v50 }
 0x104   :  { %v262_v28 = vor.u32 %v261_v10, %v260_v15  ;;  %v266_v31 = vshll.u32 %v2227_v4, %v251_v44  ;;  %v428_v32 = vsel %vm343_vm15, %v427_v13, %v403_v41  ;;  %v265_v34 = vor.u32 %v264_v16, %v263_v19 }
 0x105   :  { %v409_v23 = vclz %v1956_v48  ;;  %v1236_v33 = vshll.u32 %v1235_v61, 30  ;;  %vm269_vm1 = vcmp.lt.s32.totalorder %v2457_v6, 1  ;;  %vm270_vm2 = vcmp.lt.s32.totalorder %v2457_v6, 2 }
 0x106   :  { %v268_v38 = vor.u32 %v267_v22, %v266_v31  ;;  %vm272_vm3 = vcmp.lt.s32.totalorder %v2457_v6, 4  ;;  %vm1175_vm4 = vcmp.lt.s32.totalorder %v2328_v21, 0  ;;  %v253_v55 = vshrl.u32 %v2223_v58, %v252_v57 }
 0x107   :  { %v1957_v36 = vadd.s32 4294967294, %v409_v23  ;;  %v2478_v43 = vsub.s32 %v1233_v5, %v1236_v33  ;;  %vm271_vm5 = vcmp.lt.s32.totalorder %v2457_v6, 3  ;;  %v278_v41 = vsel %vm272_vm3, %v265_v34, 920167782 }
 0x108   :  { %v430_v44 = vsel %vm2452_vm0, 0, %v428_v32  ;;  %v277_v46 = vsel %vm269_vm1, %v256_v18, %v259_v26  ;;  %v279_v52 = vsel %vm271_vm5, %v262_v28, %v278_v41  ;;  %v1259_v3 = vsub.s32 4, %v1235_v61 }
 0x109   :  { %vm1958_vm6 = vcmp.lt.s32.totalorder %v1957_v36, 0  ;;  %v1239_v1 = vsub.s32 0, %v2478_v43  ;;  %v281_v57 = vsel %vm269_vm1, %v259_v26, %v262_v28  ;;  %vm2495_vm7 = vcmp.le.f32.partialorder %v1173_v27, 0.7853982 }
 0x10a   :  { %v412_v59 = vsel %vm1958_vm6, 0, %v1957_v36  ;;  %v274_v9 = vsel %vm272_vm3, %v262_v28, 2102212464  ;;  %v282_v10 = vsel %vm272_vm3, %v268_v38, 1326507024  ;;  %v280_v25 = vsel %vm270_vm2, %v277_v46, %v279_v52  ;;  %v2515_v28 = vpop.f32.mrb[4].mxu1 }
 0x10b   :  { %v413_v5 = vsub.s32 32, %v412_v59  ;;  %v417_v7 = vsub.s32 4294967266, %v412_v59  ;;  %v414_v13 = vshll.u32 %v2445_v54, %v412_v59  ;;  %v1988_v14 = vmin.u32 %v1239_v1, %v2478_v43 }
 0x10c   :  { %v283_v48 = vsel %vm271_vm5, %v265_v34, %v282_v10  ;;  %v1079_v16 = vadd.s32 1, %v1983_v12  ;;  %v434_v19 = vadd.s32 3, %v430_v44  ;;  %v273_v23 = vsel %vm269_vm1, %v253_v55, %v256_v18 }
 0x10d   :  { %v415_v27 = vshrl.u32 %v397_v53, %v413_v5  ;;  %v418_v50 = vadd.s32 127, %v417_v7  ;;  %v284_v15 = vsel %vm270_vm2, %v281_v57, %v283_v48  ;;  %v1241_v22 = vclz %v1988_v14 }
 0x10e   :  { %v275_v54 = vsel %vm271_vm5, %v259_v26, %v274_v9  ;;  %v2518_v33 = vmul.u32.u64.low %v2448_v49, %v284_v15  ;;  %v2519_v53 = vmul.u32.u64.high %v2448_v49, %v284_v15, %v2518_v33  ;;  %vm1080_vm8 = vcmp.gt.s32.totalorder %v1079_v16, 0 }
 0x10f   :  { %v416_v31 = vor.u32 %v415_v27, %v414_v13  ;;  %v419_v32 = vshll.u32 %v418_v50, 23  ;;  %v1989_v34 = vadd.s32 4294967294, %v1241_v22  ;;  %v1229_v18 = vadd.s32 %v2420_v35, %v2426_v39 }
 0x110   :  { %v2522_v36 = vmul.u32.u64.low %v2448_v49, %v280_v25  ;;  %v2523_v12 = vmul.u32.u64.high %v2448_v49, %v280_v25, %v2522_v36  ;;  %v1260_v26 = vsel %vm1175_vm4, %v1259_v3, %v1235_v61  ;;  %v1081_v55 = vsel %vm1080_vm8, %v1079_v16, 0 }
 0x111   :  { %v420_v38 = vor.u32 4788187, %v419_v32  ;;  %v2530_v41 = vand.u32 3, %v434_v19  ;;  %vm1990_vm9 = vcmp.lt.s32.totalorder %v1989_v34, 0  ;;  %v276_v44 = vsel %vm270_vm2, %v273_v23, %v275_v54 }
 0x112   :  { %v1083_v46 = vand.u32 31, %v1081_v55  ;;  %v423_v59 = vcvt.s32.f32 %v416_v31  ;;  %v1244_v1 = vsel %vm1990_vm9, 0, %v1989_v34  ;;  %vm294_vm10 = vc.u32 %v2519_v53, %v2522_v36 }
 0x113   :  { %v421_v52 = vand.u32 2147483647, %v420_v38  ;;  %v1245_v57 = vsub.s32 32, %v1244_v1  ;;  %v1249_v5 = vsub.s32 4294967266, %v1244_v1  ;;  %v1262_v35 = vsel %vm2495_vm7, 0, %v1260_v26 }
 0x114   :  { %v295_v39 = vadd.s32 1, %v2523_v12  ;;  %v292_v3 = vmul.u32 %v2448_v49, %v276_v44  ;;  %v2540_v7 = vshrl.u32 %v1081_v55, 5  ;;  %v1084_v6 = vsub.s32 32, %v1083_v46 }
 0x115   :  { %v424_v61 = vmul.f32 %v423_v59, %v421_v52  ;;  %v1246_v9 = vshll.u32 %v2478_v43, %v1244_v1  ;;  %v1247_v10 = vshrl.u32 %v1229_v18, %v1245_v57  ;;  %v1250_v13 = vadd.s32 127, %v1249_v5 }
 0x116   :  { %v296_v14 = vsel %vm294_vm10, %v295_v39, %v2523_v12  ;;  %v1086_v27 = vshll.u32 %v2223_v58, %v1083_v46  ;;  %v1087_v50 = vshrl.u32 %v2224_v62, %v1084_v6  ;;  %v1089_v19 = vshll.u32 %v2224_v62, %v1083_v46 }
 0x117   :  { %v425_v25 = vxor.u32 2147483648, %v424_v61  ;;  %v297_v48 = vadd.s32 %v296_v14, %v292_v3  ;;  %v1248_v15 = vor.u32 %v1247_v10, %v1246_v9  ;;  %v1251_v16 = vshll.u32 %v1250_v13, 23 }
 0x118   :  { %v1090_v49 = vshrl.u32 %v2225_v0, %v1084_v6  ;;  %v1092_v23 = vshll.u32 %v2225_v0, %v1083_v46  ;;  %v1093_v54 = vshrl.u32 %v2226_v2, %v1084_v6  ;;  %v1088_v33 = vor.u32 %v1087_v50, %v1086_v27 }
 0x119   :  { %v426_v22 = vsel %vm343_vm15, %v425_v25, %v424_v61  ;;  %v298_v43 = vadd.s32 536870912, %v297_v48  ;;  %v1252_v32 = vor.u32 4788187, %v1251_v16  ;;  %v1095_v34 = vshll.u32 %v2226_v2, %v1083_v46 }
 0x11a   :  { %v429_v31 = vsel %vm2452_vm0, %v2325_v20, %v426_v22  ;;  %v1255_v12 = vcvt.s32.f32 %v1248_v15  ;;  %v1096_v18 = vshrl.u32 %v2227_v4, %v1084_v6  ;;  %v1091_v55 = vor.u32 %v1090_v49, %v1089_v19 }
 0x11b   :  { %2133 = vcosq.f32 %v429_v31  ;;  %v2556_v38 = vshrl.u32 %v298_v43, 30  ;;  %v1253_v26 = vand.u32 2147483647, %v1252_v32  ;;  %v1099_v44 = vshrl.u32 %v2228_v11, %v1084_v6 }
 0x11c   :  { %2135 = vsinq.f32 %v429_v31  ;;  %v1097_v59 = vor.u32 %v1096_v18, %v1095_v34  ;;  %v1094_v1 = vor.u32 %v1093_v54, %v1092_v23  ;;  %v1098_v57 = vshll.u32 %v2227_v4, %v1083_v46 }
 0x11d   :  { %v300_v52 = vshll.u32 %v2556_v38, 30  ;;  %v1256_v56 = vmul.f32 %v1255_v12, %v1253_v26  ;;  %v1266_v5 = vadd.s32 3, %v1262_v35  ;;  %vm1101_vm11 = vcmp.lt.s32.totalorder %v2540_v7, 1 }
 0x11e   :  { %v2567_v61 = vshll.u32 %v1077_v51, 8  ;;  %vm437_vm12 = vcmp.eq.s32.totalorder %v2530_v41, 0  ;;  %v1100_v9 = vor.u32 %v1099_v44, %v1098_v57  ;;  %vm1104_vm13 = vcmp.lt.s32.totalorder %v2540_v7, 4 }
 0x11f   :  { %v2562_v39 = vsub.s32 %v297_v48, %v300_v52  ;;  %v1257_v3 = vxor.u32 2147483648, %v1256_v56  ;;  %v1109_v10 = vsel %vm1101_vm11, %v1088_v33, %v1091_v55  ;;  %vm436_vm14 = vcmp.lt.s32.totalorder %v2530_v41, 2 }
 0x120   :  { %v1085_v35 = vshrl.u32 %v2223_v58, %v1084_v6  ;;  %vm1103_vm15 = vcmp.lt.s32.totalorder %v2540_v7, 3  ;;  %v1110_v60 = vsel %vm1104_vm13, %v1097_v59, 920167782  ;;  %vm433_vm0 = vweird.f32 %v2325_v20 }
 0x121   :  { %v303_v46 = vsub.s32 0, %v2562_v39  ;;  %v1258_v51 = vsel %vm1175_vm4, %v1257_v3, %v1256_v56  ;;  %vm239_vm1 = vcmp.lt.s32.totalorder %v2331_v24, 0  ;;  %vm1102_vm2 = vcmp.lt.s32.totalorder %v2540_v7, 2 }
 0x122   :  { %v1106_v13 = vsel %vm1104_vm13, %v1094_v1, 2102212464  ;;  %v1111_v6 = vsel %vm1103_vm15, %v1094_v1, %v1110_v60  ;;  %v1261_v14 = vsel %vm2495_vm7, %v2328_v21, %v1258_v51  ;;  %v1113_v27 = vsel %vm1101_vm11, %v1091_v55, %v1094_v1  ;;  %v2643_v51 = vpop.f32.mrb[5].mxu0 }
 0x123   :  { %v1952_v25 = vmin.u32 %v303_v46, %v2562_v39  ;;  %v1112_v48 = vsel %vm1102_vm2, %v1109_v10, %v1111_v6  ;;  %2137 = vcosq.f32 %v1261_v14  ;;  %v1114_v50 = vsel %vm1104_vm13, %v1100_v9, 1326507024 }
 0x124   :  { %v2599_v15 = vmul.u32.u64.low %v2567_v61, %v1112_v48  ;;  %v2600_v16 = vmul.u32.u64.high %v2567_v61, %v1112_v48, %v2599_v15  ;;  %vm440_vm3 = vcmp.eq.s32.totalorder %v2530_v41, 2  ;;  %2139 = vsinq.f32 %v1261_v14 }
 0x125   :  { %v2134_v19 = vpop.eup %2133  ;;  %v305_v8 = vclz %v1952_v25  ;;  %v323_v49 = vsub.s32 4, %v2556_v38  ;;  %v1105_v23 = vsel %vm1101_vm11, %v1085_v35, %v1088_v33  ;;  %v1107_v54 = vsel %vm1103_vm15, %v1091_v55, %v1106_v13 }
 0x126   :  { %v2136_v22 = vpop.eup %2135  ;;  %v441_v43 = vxor.u32 2147483648, %v2134_v19  ;;  %v1115_v31 = vsel %vm1103_vm15, %v1097_v59, %v1114_v50  ;;  %v2615_v18 = vadd.f32 %v2337_v29, %v2322_v17  ;;  %v1267_v44 = vand.u32 3, %v1266_v5 }
 0x127   :  { %v438_v32 = vxor.u32 2147483648, %v2136_v22  ;;  %v1953_v34 = vadd.s32 4294967294, %v305_v8  ;;  %v1116_v12 = vsel %vm1102_vm2, %v1113_v27, %v1115_v31  ;;  %v1108_v59 = vsel %vm1102_vm2, %v1105_v23, %v1107_v54 }
 0x128   :  { %v442_v26 = vsel %vm440_vm3, %v441_v43, %v2136_v22  ;;  %v2618_v52 = vmul.u32.u64.low %v2567_v61, %v1116_v12  ;;  %v2619_v33 = vmul.u32.u64.high %v2567_v61, %v1116_v12, %v2618_v52  ;;  %v1127_v56 = vadd.s32 1, %v2600_v16 }
 0x129   :  { %v439_v55 = vsel %vm437_vm12, %v2134_v19, %v438_v32  ;;  %vm1954_vm4 = vcmp.lt.s32.totalorder %v1953_v34, 0  ;;  %v293_v29 = vadd.s32 %v2522_v36, %v2519_v53  ;;  %v552_v5 = vand.u32 2139095040, %v2615_v18 }
 0x12a   :  { %v443_v1 = vsel %vm436_vm14, %v439_v55, %v442_v26  ;;  %v308_v57 = vsel %vm1954_vm4, 0, %v1953_v34  ;;  %vm1265_vm5 = vweird.f32 %v2328_v21  ;;  %v324_v7 = vsel %vm239_vm1, %v323_v49, %v2556_v38 }
 0x12b   :  { %v444_v3 = vsel %vm433_vm0, nan, %v443_v1  ;;  %v309_v9 = vsub.s32 32, %v308_v57  ;;  %v313_v10 = vsub.s32 4294967266, %v308_v57  ;;  %v1124_v41 = vmul.u32 %v2567_v61, %v1108_v59 }
 0x12c   :  { %1902 = vst [vmem:[#allocation2 + $0x8] sm:$0xff] %v444_v3  ;;  %vm1126_vm6 = vc.u32 %v2619_v33, %v2599_v15  ;;  %v549_v53 = vand.u32 2147483647, %v2615_v18  ;;  %v553_v36 = vshrl.u32 %v552_v5, 23  ;;  %v310_v20 = vshll.u32 %v2562_v39, %v308_v57 }
 0x12d   :  { %v311_v46 = vshrl.u32 %v293_v29, %v309_v9  ;;  %v314_v35 = vadd.s32 127, %v313_v10  ;;  %v1128_v60 = vsel %vm1126_vm6, %v1127_v56, %v2600_v16  ;;  %v2138_v13 = vpop.eup %2137  ;;  %vm1272_vm7 = vcmp.eq.s32.totalorder %v1267_v44, 2 }
 0x12e   :  { %vm2647_vm8 = vcmp.le.f32.partialorder %v237_v45, 0.7853982  ;;  %v1129_v61 = vadd.s32 %v1128_v60, %v1124_v41  ;;  %v1963_v6 = vadd.s32 4294967169, %v553_v36  ;;  %v2140_v14 = vpop.eup %2139  ;;  %v1273_v25 = vxor.u32 2147483648, %v2138_v13 }
 0x12f   :  { %v312_v48 = vor.u32 %v311_v46, %v310_v20  ;;  %v315_v39 = vshll.u32 %v314_v35, 23  ;;  %v326_v27 = vsel %vm2647_vm8, 0, %v324_v7  ;;  %v1270_v50 = vxor.u32 2147483648, %v2140_v14 }
 0x130   :  { %v1130_v16 = vadd.s32 536870912, %v1129_v61  ;;  %v556_v19 = vand.u32 8388607, %v549_v53  ;;  %v559_v8 = vadd.s32 1, %v1963_v6  ;;  %vm1268_vm9 = vcmp.lt.s32.totalorder %v1267_v44, 2 }
 0x131   :  { %vm1269_vm10 = vcmp.eq.s32.totalorder %v1267_v44, 0  ;;  %v1274_v45 = vsel %vm1272_vm7, %v1273_v25, %v2140_v14  ;;  %v316_v49 = vor.u32 4788187, %v315_v39  ;;  %v330_v43 = vadd.s32 3, %v326_v27 }
 0x132   :  { %v1271_v22 = vsel %vm1269_vm10, %v2138_v13, %v1270_v50  ;;  %v2655_v23 = vshrl.u32 %v1130_v16, 30  ;;  %vm560_vm11 = vcmp.gt.s32.totalorder %v559_v8, 0  ;;  %v319_v32 = vcvt.s32.f32 %v312_v48 }
 0x133   :  { %v1275_v54 = vsel %vm1268_vm9, %v1271_v22, %v1274_v45  ;;  %v317_v31 = vand.u32 2147483647, %v316_v49  ;;  %v561_v34 = vsel %vm560_vm11, %v559_v8, 0  ;;  %v557_v52 = vor.u32 8388608, %v556_v19  ;;  %v2709_v45 = vpop.f32.mrb[5].mxu1 }
 0x134   :  { %v1276_v12 = vsel %vm1265_vm5, nan, %v1275_v54  ;;  %v1132_v26 = vshll.u32 %v2655_v23, 30  ;;  %v563_v44 = vand.u32 31, %v561_v34  ;;  %v2660_v59 = vand.u32 3, %v330_v43 }
 0x135   :  { %1910 = vst [vmem:[#allocation2 + $0x48] sm:$0xff] %v1276_v12  ;;  %v320_v55 = vmul.f32 %v319_v32, %v317_v31  ;;  %v1125_v29 = vadd.s32 %v2599_v15, %v2619_v33  ;;  %v2668_v5 = vadd.f32 %v2339_v30, %v2322_v17  ;;  %v2671_v3 = vshrl.u32 %v561_v34, 5 }
 0x136   :  { %v2662_v56 = vsub.s32 %v1129_v61, %v1132_v26  ;;  %v564_v57 = vsub.s32 32, %v563_v44  ;;  %v2673_v9 = vshll.u32 %v557_v52, 8  ;;  %v2677_v10 = vadd.f32 %v2322_v17, %v2346_v37 }
 0x137   :  { %v321_v1 = vxor.u32 2147483648, %v320_v55  ;;  %v566_v15 = vshll.u32 %v2223_v58, %v563_v44  ;;  %v569_v20 = vshll.u32 %v2224_v62, %v563_v44  ;;  %v1155_v37 = vsub.s32 4, %v2655_v23 }
 0x138   :  { %v1135_v21 = vsub.s32 0, %v2662_v56  ;;  %v567_v33 = vshrl.u32 %v2224_v62, %v564_v57  ;;  %v570_v30 = vshrl.u32 %v2225_v0, %v564_v57  ;;  %v573_v17 = vshrl.u32 %v2226_v2, %v564_v57 }
 0x139   :  { %v322_v7 = vsel %vm239_vm1, %v321_v1, %v320_v55  ;;  %v572_v46 = vshll.u32 %v2225_v0, %v563_v44  ;;  %v1384_v35 = vand.u32 2139095040, %v2668_v5  ;;  %v575_v38 = vshll.u32 %v2226_v2, %v563_v44 }
 0x13a   :  { %v325_v41 = vsel %vm2647_vm8, %v2331_v24, %v322_v7  ;;  %v1984_v36 = vmin.u32 %v1135_v21, %v2662_v56  ;;  %v568_v13 = vor.u32 %v567_v33, %v566_v15  ;;  %v571_v61 = vor.u32 %v570_v30, %v569_v20 }
 0x13b   :  { %2141 = vcosq.f32 %v325_v41  ;;  %v574_v6 = vor.u32 %v573_v17, %v572_v46  ;;  %v576_v14 = vshrl.u32 %v2227_v4, %v564_v57  ;;  %vm581_vm12 = vcmp.lt.s32.totalorder %v2671_v3, 1 }
 0x13c   :  { %2143 = vsinq.f32 %v325_v41  ;;  %v1137_v60 = vclz %v1984_v36  ;;  %v578_v48 = vshll.u32 %v2227_v4, %v563_v44  ;;  %v579_v39 = vshrl.u32 %v2228_v11, %v564_v57 }
 0x13d   :  { %vm582_vm13 = vcmp.lt.s32.totalorder %v2671_v3, 2  ;;  %vm336_vm14 = vcmp.eq.s32.totalorder %v2660_v59, 2  ;;  %v565_v27 = vshrl.u32 %v2223_v58, %v564_v57  ;;  %v577_v50 = vor.u32 %v576_v14, %v575_v38 }
 0x13e   :  { %v1985_v25 = vadd.s32 4294967294, %v1137_v60  ;;  %vm583_vm15 = vcmp.lt.s32.totalorder %v2671_v3, 3  ;;  %vm584_vm0 = vcmp.lt.s32.totalorder %v2671_v3, 4  ;;  %vm333_vm1 = vcmp.eq.s32.totalorder %v2660_v59, 0 }
 0x13f   :  { %vm1071_vm2 = vcmp.lt.s32.totalorder %v2349_v42, 0  ;;  %v580_v16 = vor.u32 %v579_v39, %v578_v48  ;;  %v586_v19 = vsel %vm584_vm0, %v574_v6, 2102212464  ;;  %v589_v8 = vsel %vm581_vm12, %v568_v13, %v571_v61 }
 0x140   :  { %vm1986_vm3 = vcmp.lt.s32.totalorder %v1985_v25, 0  ;;  %vm332_vm4 = vcmp.lt.s32.totalorder %v2660_v59, 2  ;;  %v585_v22 = vsel %vm581_vm12, %v565_v27, %v568_v13  ;;  %v590_v43 = vsel %vm584_vm0, %v577_v50, 920167782 }
 0x141   :  { %v1140_v49 = vsel %vm1986_vm3, 0, %v1985_v25  ;;  %v1385_v54 = vshrl.u32 %v1384_v35, 23  ;;  %vm329_vm5 = vweird.f32 %v2331_v24  ;;  %v591_v34 = vsel %vm583_vm15, %v574_v6, %v590_v43 }
 0x142   :  { %v1141_v31 = vsub.s32 32, %v1140_v49  ;;  %v1145_v32 = vsub.s32 4294967266, %v1140_v49  ;;  %v593_v12 = vsel %vm581_vm12, %v571_v61, %v574_v6  ;;  %vm2723_vm6 = vcmp.le.f32.partialorder %v1069_v40, 0.7853982 }
 0x143   :  { %v587_v52 = vsel %vm583_vm15, %v571_v61, %v586_v19  ;;  %v592_v55 = vsel %vm582_vm13, %v589_v8, %v591_v34  ;;  %v594_v44 = vsel %vm584_vm0, %v580_v16, 1326507024  ;;  %v1995_v1 = vadd.s32 4294967169, %v1385_v54 }
 0x144   :  { %v1142_v57 = vshll.u32 %v2662_v56, %v1140_v49  ;;  %v1143_v21 = vshrl.u32 %v1125_v29, %v1141_v31  ;;  %v1146_v7 = vadd.s32 127, %v1145_v32  ;;  %v595_v40 = vsel %vm583_vm15, %v577_v50, %v594_v44 }
 0x145   :  { %v2142_v15 = vpop.eup %2141  ;;  %v596_v33 = vsel %vm582_vm13, %v593_v12, %v595_v40  ;;  %v2739_v30 = vmul.u32.u64.low %v2673_v9, %v592_v55  ;;  %v2740_v41 = vmul.u32.u64.high %v2673_v9, %v592_v55, %v2739_v30  ;;  %v1391_v36 = vadd.s32 1, %v1995_v1 }
 0x146   :  { %v2144_v20 = vpop.eup %2143  ;;  %v337_v17 = vxor.u32 2147483648, %v2142_v15  ;;  %v1144_v46 = vor.u32 %v1143_v21, %v1142_v57  ;;  %v1147_v35 = vshll.u32 %v1146_v7, 23  ;;  %v1381_v56 = vand.u32 2147483647, %v2668_v5 }
 0x147   :  { %v334_v29 = vxor.u32 2147483648, %v2144_v20  ;;  %v2745_v60 = vmul.u32.u64.low %v2673_v9, %v596_v33  ;;  %v2746_v13 = vmul.u32.u64.high %v2673_v9, %v596_v33, %v2745_v60  ;;  %vm1392_vm7 = vcmp.gt.s32.totalorder %v1391_v36, 0 }
 0x148   :  { %v338_v61 = vsel %vm336_vm14, %v337_v17, %v2144_v20  ;;  %v1148_v6 = vor.u32 4788187, %v1147_v35  ;;  %v588_v38 = vsel %vm582_vm13, %v585_v22, %v587_v52  ;;  %v1393_v14 = vsel %vm1392_vm7, %v1391_v36, 0 }
 0x149   :  { %v335_v25 = vsel %vm333_vm1, %v2142_v15, %v334_v29  ;;  %v1156_v48 = vsel %vm1071_vm2, %v1155_v37, %v2655_v23  ;;  %v607_v39 = vadd.s32 1, %v2740_v41  ;;  %v1395_v27 = vand.u32 31, %v1393_v14 }
 0x14a   :  { %v339_v50 = vsel %vm332_vm4, %v335_v25, %v338_v61  ;;  %v1149_v16 = vand.u32 2147483647, %v1148_v6  ;;  %v1151_v19 = vcvt.s32.f32 %v1144_v46  ;;  %v1388_v3 = vand.u32 8388607, %v1381_v56 }
 0x14b   :  { %v340_v8 = vsel %vm329_vm5, nan, %v339_v50  ;;  %v604_v49 = vmul.u32 %v2673_v9, %v588_v38  ;;  %vm606_vm8 = vc.u32 %v2746_v13, %v2739_v30  ;;  %v1396_v23 = vsub.s32 32, %v1395_v27 }
 0x14c   :  { %1901 = vst [vmem:[#allocation2] sm:$0xff] %v340_v8  ;;  %v1152_v37 = vmul.f32 %v1151_v19, %v1149_v16  ;;  %v1158_v59 = vsel %vm2723_vm6, 0, %v1156_v48  ;;  %v608_v22 = vsel %vm606_vm8, %v607_v39, %v2740_v41  ;;  %v1394_v43 = vshrl.u32 %v1393_v14, 5 }
 0x14d   :  { %v609_v54 = vadd.s32 %v608_v22, %v604_v49  ;;  %v1398_v31 = vshll.u32 %v2223_v58, %v1395_v27  ;;  %v1399_v24 = vshrl.u32 %v2224_v62, %v1396_v23  ;;  %v1402_v32 = vshrl.u32 %v2225_v0, %v1396_v23 }
 0x14e   :  { %v1153_v9 = vxor.u32 2147483648, %v1152_v37  ;;  %v1401_v34 = vshll.u32 %v2224_v62, %v1395_v27  ;;  %v1404_v12 = vshll.u32 %v2225_v0, %v1395_v27  ;;  %v1405_v52 = vshrl.u32 %v2226_v2, %v1396_v23 }
 0x14f   :  { %v610_v55 = vadd.s32 536870912, %v609_v54  ;;  %v1400_v44 = vor.u32 %v1399_v24, %v1398_v31  ;;  %v1407_v1 = vshll.u32 %v2226_v2, %v1395_v27  ;;  %v1408_v57 = vshrl.u32 %v2227_v4, %v1396_v23 }
 0x150   :  { %v1154_v21 = vsel %vm1071_vm2, %v1153_v9, %v1152_v37  ;;  %v1403_v7 = vor.u32 %v1402_v32, %v1401_v34  ;;  %v1406_v40 = vor.u32 %v1405_v52, %v1404_v12  ;;  %v1411_v15 = vshrl.u32 %v2228_v11, %v1396_v23 }
 0x151   :  { %v1157_v33 = vsel %vm2723_vm6, %v2349_v42, %v1154_v21  ;;  %v611_v41 = vshrl.u32 %v610_v55, 30  ;;  %v1409_v36 = vor.u32 %v1408_v57, %v1407_v1  ;;  %v1410_v20 = vshll.u32 %v2227_v4, %v1395_v27 }
 0x152   :  { %2145 = vcosq.f32 %v1157_v33  ;;  %v1162_v17 = vadd.s32 3, %v1158_v59  ;;  %v1389_v46 = vor.u32 8388608, %v1388_v3  ;;  %vm1413_vm9 = vcmp.lt.s32.totalorder %v1394_v43, 1 }
 0x153   :  { %2147 = vsinq.f32 %v1157_v33  ;;  %v612_v35 = vshll.u32 %v611_v41, 30  ;;  %v1412_v29 = vor.u32 %v1411_v15, %v1410_v20  ;;  %vm1416_vm10 = vcmp.lt.s32.totalorder %v1394_v43, 4 }
 0x154   :  { %v1397_v60 = vshrl.u32 %v2223_v58, %v1396_v23  ;;  %vm1415_vm11 = vcmp.lt.s32.totalorder %v1394_v43, 3  ;;  %v1421_v61 = vsel %vm1413_vm9, %v1400_v44, %v1403_v7  ;;  %v1422_v26 = vsel %vm1416_vm10, %v1409_v36, 920167782 }
 0x155   :  { %v2790_v6 = vsub.s32 %v609_v54, %v612_v35  ;;  %vm1414_vm12 = vcmp.lt.s32.totalorder %v1394_v43, 2  ;;  %v1418_v38 = vsel %vm1416_vm10, %v1406_v40, 2102212464  ;;  %v1423_v14 = vsel %vm1415_vm11, %v1406_v40, %v1422_v26 }
 0x156   :  { %v635_v25 = vsub.s32 4, %v611_v41  ;;  %v1424_v48 = vsel %vm1414_vm12, %v1421_v61, %v1423_v14  ;;  %v1425_v39 = vsel %vm1413_vm9, %v1403_v7, %v1406_v40  ;;  %v1429_v27 = vshll.u32 %v1389_v46, 8 }
 0x157   :  { %v1163_v50 = vand.u32 3, %v1162_v17  ;;  %v615_v16 = vsub.s32 0, %v2790_v6  ;;  %v1417_v19 = vsel %vm1413_vm9, %v1397_v60, %v1400_v44  ;;  %v1426_v3 = vsel %vm1416_vm10, %v1412_v29, 1326507024 }
 0x158   :  { %v1419_v8 = vsel %vm1415_vm11, %v1403_v7, %v1418_v38  ;;  %v1427_v49 = vsel %vm1415_vm11, %v1409_v36, %v1426_v3  ;;  %v2801_v23 = vmul.u32.u64.low %v1429_v27, %v1424_v48  ;;  %v2802_v37 = vmul.u32.u64.high %v1429_v27, %v1424_v48, %v2801_v23  ;;  %v2835_v48 = vpop.f32.mrb[6].mxu0 }
 0x159   :  { %vm1161_vm13 = vweird.f32 %v2349_v42  ;;  %vm551_vm14 = vcmp.lt.s32.totalorder %v2615_v18, 0  ;;  %v1964_v59 = vmin.u32 %v615_v16, %v2790_v6  ;;  %v1428_v22 = vsel %vm1414_vm12, %v1425_v39, %v1427_v49 }
 0x15a   :  { %v636_v54 = vsel %vm551_vm14, %v635_v25, %v611_v41  ;;  %v2810_v31 = vmul.u32.u64.low %v1429_v27, %v1428_v22  ;;  %v2811_v24 = vmul.u32.u64.high %v1429_v27, %v1428_v22, %v2810_v31  ;;  %v448_v32 = vand.u32 2139095040, %v2677_v10 }
 0x15b   :  { %vm2816_vm15 = vcmp.le.f32.partialorder %v549_v53, 0.7853982  ;;  %v617_v34 = vclz %v1964_v59  ;;  %v1420_v12 = vsel %vm1414_vm12, %v1417_v19, %v1419_v8  ;;  %v445_v52 = vand.u32 2147483647, %v2677_v10 }
 0x15c   :  { %v2146_v55 = vpop.eup %2145  ;;  %vm1164_vm0 = vcmp.lt.s32.totalorder %v1163_v50, 2  ;;  %vm1165_vm1 = vcmp.eq.s32.totalorder %v1163_v50, 0  ;;  %v1439_v44 = vadd.s32 1, %v2802_v37  ;;  %v449_v1 = vshrl.u32 %v448_v32, 23 }
 0x15d   :  { %v2148_v57 = vpop.eup %2147  ;;  %vm1168_vm2 = vcmp.eq.s32.totalorder %v1163_v50, 2  ;;  %v1169_v21 = vxor.u32 2147483648, %v2146_v55  ;;  %v1965_v7 = vadd.s32 4294967294, %v617_v34  ;;  %v638_v53 = vsel %vm2816_vm15, 0, %v636_v54 }
 0x15e   :  { %v1166_v40 = vxor.u32 2147483648, %v2148_v57  ;;  %v1436_v15 = vmul.u32 %v1429_v27, %v1420_v12  ;;  %vm1438_vm3 = vc.u32 %v2811_v24, %v2801_v23  ;;  %v1959_v43 = vadd.s32 4294967169, %v449_v1 }
 0x15f   :  { %v1170_v33 = vsel %vm1168_vm2, %v1169_v21, %v2148_v57  ;;  %vm1966_vm4 = vcmp.lt.s32.totalorder %v1965_v7, 0  ;;  %v1440_v41 = vsel %vm1438_vm3, %v1439_v44, %v2802_v37  ;;  %v452_v36 = vand.u32 8388607, %v445_v52 }
 0x160   :  { %v1167_v20 = vsel %vm1165_vm1, %v2146_v55, %v1166_v40  ;;  %v620_v17 = vsel %vm1966_vm4, 0, %v1965_v7  ;;  %v1441_v46 = vadd.s32 %v1440_v41, %v1436_v15  ;;  %v455_v35 = vadd.s32 1, %v1959_v43 }
 0x161   :  { %v1171_v29 = vsel %vm1164_vm0, %v1167_v20, %v1170_v33  ;;  %v605_v60 = vadd.s32 %v2739_v30, %v2746_v13  ;;  %v621_v61 = vsub.s32 32, %v620_v17  ;;  %v625_v26 = vsub.s32 4294967266, %v620_v17 }
 0x162   :  { %v1172_v38 = vsel %vm1161_vm13, nan, %v1171_v29  ;;  %v642_v14 = vadd.s32 3, %v638_v53  ;;  %v1442_v25 = vadd.s32 536870912, %v1441_v46  ;;  %vm456_vm5 = vcmp.gt.s32.totalorder %v455_v35, 0 }
 0x163   :  { %1909 = vst [vmem:[#allocation2 + $0x40] sm:$0xff] %v1172_v38  ;;  %v622_v39 = vshll.u32 %v2790_v6, %v620_v17  ;;  %v623_v27 = vshrl.u32 %v605_v60, %v621_v61  ;;  %v626_v16 = vadd.s32 127, %v625_v26  ;;  %v457_v50 = vsel %vm456_vm5, %v455_v35, 0  ;;  %v2845_v6 = vld [vmem:[%s3635_s2] ss:$0 sm:$0xff] }
 0x164   :  { %v1443_v19 = vshrl.u32 %v1442_v25, 30  ;;  %v453_v3 = vor.u32 8388608, %v452_v36  ;;  %v459_v8 = vand.u32 31, %v457_v50  ;;  %v2838_v49 = vand.u32 3, %v642_v14 }
 0x165   :  { %v624_v30 = vor.u32 %v623_v27, %v622_v39  ;;  %v627_v13 = vshll.u32 %v626_v16, 23  ;;  %vm1383_vm6 = vcmp.lt.s32.totalorder %v2668_v5, 0  ;;  %v1437_v22 = vadd.s32 %v2801_v23, %v2811_v24 }
 0x166   :  { %v1444_v42 = vshll.u32 %v1443_v19, 30  ;;  %v460_v37 = vsub.s32 32, %v459_v8  ;;  %v2849_v54 = vadd.f32 %v2845_v6, %v2352_v47  ;;  %v2853_v31 = vadd.f32 %v2845_v6, %v2435_v63 }
 0x167   :  { %v628_v59 = vor.u32 4788187, %v627_v13  ;;  %v458_v34 = vshrl.u32 %v457_v50, 5  ;;  %v2858_v55 = vshll.u32 %v453_v3, 8  ;;  %v631_v24 = vcvt.s32.f32 %v624_v30 }
 0x168   :  { %v2855_v32 = vsub.s32 %v1441_v46, %v1444_v42  ;;  %v463_v12 = vshrl.u32 %v2224_v62, %v460_v37  ;;  %v466_v44 = vshrl.u32 %v2225_v0, %v460_v37  ;;  %v469_v1 = vshrl.u32 %v2226_v2, %v460_v37 }
 0x169   :  { %v629_v23 = vand.u32 2147483647, %v628_v59  ;;  %v1467_v57 = vsub.s32 4, %v1443_v19  ;;  %v462_v21 = vshll.u32 %v2223_v58, %v459_v8  ;;  %v465_v63 = vshll.u32 %v2224_v62, %v459_v8 }
 0x16a   :  { %v1447_v47 = vsub.s32 0, %v2855_v32  ;;  %v468_v53 = vshll.u32 %v2225_v0, %v459_v8  ;;  %v471_v40 = vshll.u32 %v2226_v2, %v459_v8  ;;  %v472_v15 = vshrl.u32 %v2227_v4, %v460_v37 }
 0x16b   :  { %v632_v7 = vmul.f32 %v631_v24, %v629_v23  ;;  %v464_v33 = vor.u32 %v463_v12, %v462_v21  ;;  %v467_v41 = vor.u32 %v466_v44, %v465_v63  ;;  %v475_v36 = vshrl.u32 %v2228_v11, %v460_v37 }
 0x16c   :  { %v1996_v43 = vmin.u32 %v1447_v47, %v2855_v32  ;;  %v470_v17 = vor.u32 %v469_v1, %v468_v53  ;;  %v473_v46 = vor.u32 %v472_v15, %v471_v40  ;;  %v474_v35 = vshll.u32 %v2227_v4, %v459_v8  ;;  %v2883_v8 = vpop.f32.mrb[6].mxu1 }
 0x16d   :  { %v633_v20 = vxor.u32 2147483648, %v632_v7  ;;  %v1468_v60 = vsel %vm1383_vm6, %v1467_v57, %v1443_v19  ;;  %v461_v61 = vshrl.u32 %v2223_v58, %v460_v37  ;;  %v1280_v26 = vand.u32 2139095040, %v2849_v54 }
 0x16e   :  { %v1449_v29 = vclz %v1996_v43  ;;  %v476_v14 = vor.u32 %v475_v36, %v474_v35  ;;  %vm477_vm7 = vcmp.lt.s32.totalorder %v458_v34, 1  ;;  %vm478_vm8 = vcmp.lt.s32.totalorder %v458_v34, 2 }
 0x16f   :  { %v634_v38 = vsel %vm551_vm14, %v633_v20, %v632_v7  ;;  %vm479_vm9 = vcmp.lt.s32.totalorder %v458_v34, 3  ;;  %vm480_vm10 = vcmp.lt.s32.totalorder %v458_v34, 4  ;;  %v485_v16 = vsel %vm477_vm7, %v464_v33, %v467_v41 }
 0x170   :  { %v637_v25 = vsel %vm2816_vm15, %v2615_v18, %v634_v38  ;;  %v1997_v39 = vadd.s32 4294967294, %v1449_v29  ;;  %v482_v27 = vsel %vm480_vm10, %v470_v17, 2102212464  ;;  %v486_v50 = vsel %vm480_vm10, %v473_v46, 920167782 }
 0x171   :  { %2149 = vcosq.f32 %v637_v25  ;;  %v481_v19 = vsel %vm477_vm7, %v461_v61, %v464_v33  ;;  %v487_v3 = vsel %vm479_vm9, %v470_v17, %v486_v50  ;;  %v489_v13 = vsel %vm477_vm7, %v467_v41, %v470_v17 }
 0x172   :  { %2151 = vsinq.f32 %v637_v25  ;;  %vm1998_vm11 = vcmp.lt.s32.totalorder %v1997_v39, 0  ;;  %v488_v9 = vsel %vm478_vm8, %v485_v16, %v487_v3  ;;  %v490_v42 = vsel %vm480_vm10, %v476_v14, 1326507024 }
 0x173   :  { %v1452_v30 = vsel %vm1998_vm11, 0, %v1997_v39  ;;  %v483_v12 = vsel %vm479_vm9, %v467_v41, %v482_v27  ;;  %v491_v23 = vsel %vm479_vm9, %v473_v46, %v490_v42  ;;  %vm2902_vm12 = vcmp.le.f32.partialorder %v1381_v56, 0.7853982 }
 0x174   :  { %v1453_v37 = vsub.s32 32, %v1452_v30  ;;  %v1457_v59 = vsub.s32 4294967266, %v1452_v30  ;;  %v1454_v24 = vshll.u32 %v2855_v32, %v1452_v30  ;;  %v492_v44 = vsel %vm478_vm8, %v489_v13, %v491_v23 }
 0x175   :  { %v2892_v1 = vmul.u32.u64.low %v2858_v55, %v488_v9  ;;  %v2893_v47 = vmul.u32.u64.high %v2858_v55, %v488_v9, %v2892_v1  ;;  %v2897_v63 = vmul.u32.u64.low %v2858_v55, %v492_v44  ;;  %v2898_v7 = vmul.u32.u64.high %v2858_v55, %v492_v44, %v2897_v63 }
 0x176   :  { %v1455_v57 = vshrl.u32 %v1437_v22, %v1453_v37  ;;  %v1458_v21 = vadd.s32 127, %v1457_v59  ;;  %v484_v32 = vsel %vm478_vm8, %v481_v19, %v483_v12  ;;  %v1281_v40 = vshrl.u32 %v1280_v26, 23 }
 0x177   :  { %v1470_v33 = vsel %vm2902_vm12, 0, %v1468_v60  ;;  %v503_v22 = vadd.s32 1, %v2893_v47  ;;  %v1277_v41 = vand.u32 2147483647, %v2849_v54  ;;  %v760_v20 = vand.u32 2139095040, %v2853_v31 }
 0x178   :  { %v1456_v15 = vor.u32 %v1455_v57, %v1454_v24  ;;  %v1459_v43 = vshll.u32 %v1458_v21, 23  ;;  %v1991_v36 = vadd.s32 4294967169, %v1281_v40  ;;  %vm645_vm13 = vcmp.eq.s32.totalorder %v2838_v49, 0 }
 0x179   :  { %v500_v17 = vmul.u32 %v2858_v55, %v484_v32  ;;  %vm502_vm14 = vc.u32 %v2898_v7, %v2892_v1  ;;  %vm648_vm15 = vcmp.eq.s32.totalorder %v2838_v49, 2  ;;  %v1474_v46 = vadd.s32 3, %v1470_v33 }
 0x17a   :  { %v1460_v56 = vor.u32 4788187, %v1459_v43  ;;  %v504_v35 = vsel %vm502_vm14, %v503_v22, %v2893_v47  ;;  %v1287_v29 = vadd.s32 1, %v1991_v36  ;;  %v1463_v38 = vcvt.s32.f32 %v1456_v15 }
 0x17b   :  { %v2150_v34 = vpop.eup %2149  ;;  %v505_v14 = vadd.s32 %v504_v35, %v500_v17  ;;  %v1284_v39 = vand.u32 8388607, %v1277_v41  ;;  %v761_v55 = vshrl.u32 %v760_v20, 23  ;;  %vm641_vm1 = vweird.f32 %v2615_v18 }
 0x17c   :  { %v2152_v60 = vpop.eup %2151  ;;  %v649_v61 = vxor.u32 2147483648, %v2150_v34  ;;  %v1461_v26 = vand.u32 2147483647, %v1460_v56  ;;  %vm1288_vm0 = vcmp.gt.s32.totalorder %v1287_v29, 0  ;;  %vm644_vm2 = vcmp.lt.s32.totalorder %v2838_v49, 2 }
 0x17d   :  { %v646_v25 = vxor.u32 2147483648, %v2152_v60  ;;  %v506_v50 = vadd.s32 536870912, %v505_v14  ;;  %v1289_v19 = vsel %vm1288_vm0, %v1287_v29, 0  ;;  %v2924_v42 = vand.u32 3, %v1474_v46 }
 0x17e   :  { %v650_v27 = vsel %vm648_vm15, %v649_v61, %v2152_v60  ;;  %v1464_v16 = vmul.f32 %v1463_v38, %v1461_v26  ;;  %v1291_v30 = vand.u32 31, %v1289_v19  ;;  %v1285_v12 = vor.u32 8388608, %v1284_v39 }
 0x17f   :  { %v647_v3 = vsel %vm645_vm13, %v2150_v34, %v646_v25  ;;  %v2926_v37 = vshrl.u32 %v506_v50, 30  ;;  %v757_v24 = vand.u32 2147483647, %v2853_v31  ;;  %v1971_v47 = vadd.s32 4294967169, %v761_v55 }
 0x180   :  { %v651_v9 = vsel %vm644_vm2, %v647_v3, %v650_v27  ;;  %v1465_v13 = vxor.u32 2147483648, %v1464_v16  ;;  %v1292_v23 = vsub.s32 32, %v1291_v30  ;;  %v1294_v49 = vshll.u32 %v2223_v58, %v1291_v30 }
 0x181   :  { %v652_v59 = vsel %vm641_vm1, nan, %v651_v9  ;;  %v508_v44 = vshll.u32 %v2926_v37, 30  ;;  %v1297_v63 = vshll.u32 %v2224_v62, %v1291_v30  ;;  %v1300_v15 = vshll.u32 %v2225_v0, %v1291_v30 }
 0x182   :  { %1904 = vst [vmem:[#allocation2 + $0x18] sm:$0xff] %v652_v59  ;;  %v1466_v18 = vsel %vm1383_vm6, %v1465_v13, %v1464_v16  ;;  %v1295_v21 = vshrl.u32 %v2224_v62, %v1292_v23  ;;  %v1298_v32 = vshrl.u32 %v2225_v0, %v1292_v23  ;;  %v1301_v43 = vshrl.u32 %v2226_v2, %v1292_v23 }
 0x183   :  { %v1469_v57 = vsel %vm2902_vm12, %v2668_v5, %v1466_v18  ;;  %v2939_v40 = vsub.s32 %v505_v14, %v508_v44  ;;  %v501_v33 = vadd.s32 %v2892_v1, %v2898_v7  ;;  %v1290_v22 = vshrl.u32 %v1289_v19, 5 }
 0x184   :  { %2153 = vcosq.f32 %v1469_v57  ;;  %v2945_v53 = vshll.u32 %v1285_v12, 8  ;;  %v1296_v20 = vor.u32 %v1295_v21, %v1294_v49  ;;  %v1299_v56 = vor.u32 %v1298_v32, %v1297_v63  ;;  %v2975_v32 = vpop.f32.mrb[7].mxu0 }
 0x185   :  { %2155 = vsinq.f32 %v1469_v57  ;;  %v511_v36 = vsub.s32 0, %v2939_v40  ;;  %v1302_v17 = vor.u32 %v1301_v43, %v1300_v15  ;;  %v1303_v34 = vshll.u32 %v2226_v2, %v1291_v30 }
 0x186   :  { %v1304_v46 = vshrl.u32 %v2227_v4, %v1292_v23  ;;  %v1306_v35 = vshll.u32 %v2227_v4, %v1291_v30  ;;  %v1307_v29 = vshrl.u32 %v2228_v11, %v1292_v23  ;;  %vm1480_vm3 = vcmp.eq.s32.totalorder %v2924_v42, 2 }
 0x187   :  { %v1960_v1 = vmin.u32 %v511_v36, %v2939_v40  ;;  %v531_v7 = vsub.s32 4, %v2926_v37  ;;  %v2957_v60 = vand.u32 8388607, %v757_v24  ;;  %v767_v61 = vadd.s32 1, %v1971_v47 }
 0x188   :  { %vm1477_vm4 = vcmp.eq.s32.totalorder %v2924_v42, 0  ;;  %v1293_v26 = vshrl.u32 %v2223_v58, %v1292_v23  ;;  %v1305_v38 = vor.u32 %v1304_v46, %v1303_v34  ;;  %v1308_v14 = vor.u32 %v1307_v29, %v1306_v35 }
 0x189   :  { %vm1309_vm5 = vcmp.lt.s32.totalorder %v1290_v22, 1  ;;  %vm1476_vm6 = vcmp.lt.s32.totalorder %v2924_v42, 2  ;;  %vm447_vm7 = vcmp.lt.s32.totalorder %v2677_v10, 0  ;;  %v513_v25 = vclz %v1960_v1 }
 0x18a   :  { %vm1310_vm8 = vcmp.lt.s32.totalorder %v1290_v22, 2  ;;  %vm1311_vm9 = vcmp.lt.s32.totalorder %v1290_v22, 3  ;;  %vm1312_vm10 = vcmp.lt.s32.totalorder %v1290_v22, 4  ;;  %vm1473_vm11 = vweird.f32 %v2668_v5 }
 0x18b   :  { %v1314_v39 = vsel %vm1312_vm10, %v1302_v17, 2102212464  ;;  %v1317_v55 = vsel %vm1309_vm5, %v1296_v20, %v1299_v56  ;;  %v1318_v27 = vsel %vm1312_vm10, %v1305_v38, 920167782  ;;  %v1321_v16 = vsel %vm1309_vm5, %v1299_v56, %v1302_v17 }
 0x18c   :  { %v1961_v50 = vadd.s32 4294967294, %v513_v25  ;;  %v1313_v19 = vsel %vm1309_vm5, %v1293_v26, %v1296_v20  ;;  %v1319_v3 = vsel %vm1311_vm9, %v1302_v17, %v1318_v27  ;;  %v1322_v30 = vsel %vm1312_vm10, %v1308_v14, 1326507024 }
 0x18d   :  { %v1315_v9 = vsel %vm1311_vm9, %v1299_v56, %v1314_v39  ;;  %v1320_v13 = vsel %vm1310_vm8, %v1317_v55, %v1319_v3  ;;  %v1323_v59 = vsel %vm1311_vm9, %v1305_v38, %v1322_v30  ;;  %vm768_vm12 = vcmp.gt.s32.totalorder %v767_v61, 0 }
 0x18e   :  { %v2154_v12 = vpop.eup %2153  ;;  %vm1962_vm13 = vcmp.lt.s32.totalorder %v1961_v50, 0  ;;  %v1324_v23 = vsel %vm1310_vm8, %v1321_v16, %v1323_v59  ;;  %v2967_v18 = vmul.u32.u64.low %v2945_v53, %v1320_v13  ;;  %v2968_v44 = vmul.u32.u64.high %v2945_v53, %v1320_v13, %v2967_v18 }
 0x18f   :  { %v2156_v49 = vpop.eup %2155  ;;  %v1481_v47 = vxor.u32 2147483648, %v2154_v12  ;;  %v516_v57 = vsel %vm1962_vm13, 0, %v1961_v50  ;;  %v2972_v21 = vmul.u32.u64.low %v2945_v53, %v1324_v23  ;;  %v2973_v63 = vmul.u32.u64.high %v2945_v53, %v1324_v23, %v2972_v21 }
 0x190   :  { %v1478_v15 = vxor.u32 2147483648, %v2156_v49  ;;  %v517_v43 = vsub.s32 32, %v516_v57  ;;  %v521_v36 = vsub.s32 4294967266, %v516_v57  ;;  %v1316_v20 = vsel %vm1310_vm8, %v1313_v19, %v1315_v9 }
 0x191   :  { %v1482_v56 = vsel %vm1480_vm3, %v1481_v47, %v2156_v49  ;;  %v518_v17 = vshll.u32 %v2939_v40, %v516_v57  ;;  %v765_v34 = vor.u32 8388608, %v2957_v60  ;;  %v769_v46 = vsel %vm768_vm12, %v767_v61, 0 }
 0x192   :  { %v1479_v35 = vsel %vm1477_vm4, %v2154_v12, %v1478_v15  ;;  %v519_v29 = vshrl.u32 %v501_v33, %v517_v43  ;;  %v522_v1 = vadd.s32 127, %v521_v36  ;;  %v1335_v26 = vadd.s32 1, %v2968_v44 }
 0x193   :  { %v1483_v22 = vsel %vm1476_vm6, %v1479_v35, %v1482_v56  ;;  %v532_v38 = vsel %vm447_vm7, %v531_v7, %v2926_v37  ;;  %v1332_v40 = vmul.u32 %v2945_v53, %v1316_v20  ;;  %vm1334_vm14 = vc.u32 %v2973_v63, %v2967_v18 }
 0x194   :  { %v1484_v60 = vsel %vm1473_vm11, nan, %v1483_v22  ;;  %v520_v61 = vor.u32 %v519_v29, %v518_v17  ;;  %v523_v33 = vshll.u32 %v522_v1, 23  ;;  %v1336_v14 = vsel %vm1334_vm14, %v1335_v26, %v2968_v44 }
 0x195   :  { %1912 = vst [vmem:[#allocation2 + $0x58] sm:$0xff] %v1484_v60  ;;  %vm2999_vm15 = vcmp.le.f32.partialorder %v445_v52, 0.7853982  ;;  %v1337_v37 = vadd.s32 %v1336_v14, %v1332_v40  ;;  %v771_v7 = vand.u32 31, %v769_v46  ;;  %v3005_v39 = vshll.u32 %v765_v34, 8 }
 0x196   :  { %v524_v53 = vor.u32 4788187, %v523_v33  ;;  %v534_v25 = vsel %vm2999_vm15, 0, %v532_v38  ;;  %v527_v5 = vcvt.s32.f32 %v520_v61  ;;  %v3007_v27 = vshrl.u32 %v769_v46, 5 }
 0x197   :  { %v1338_v55 = vadd.s32 536870912, %v1337_v37  ;;  %v772_v16 = vsub.s32 32, %v771_v7  ;;  %v774_v19 = vshll.u32 %v2223_v58, %v771_v7  ;;  %v777_v52 = vshll.u32 %v2224_v62, %v771_v7 }
 0x198   :  { %v525_v50 = vand.u32 2147483647, %v524_v53  ;;  %v780_v3 = vshll.u32 %v2225_v0, %v771_v7  ;;  %v783_v59 = vshll.u32 %v2226_v2, %v771_v7  ;;  %v538_v47 = vadd.s32 3, %v534_v25 }
 0x199   :  { %v1339_v30 = vshrl.u32 %v1338_v55, 30  ;;  %v775_v9 = vshrl.u32 %v2224_v62, %v772_v16  ;;  %v778_v13 = vshrl.u32 %v2225_v0, %v772_v16  ;;  %v781_v23 = vshrl.u32 %v2226_v2, %v772_v16 }
 0x19a   :  { %v528_v12 = vmul.f32 %v527_v5, %v525_v50  ;;  %v784_v44 = vshrl.u32 %v2227_v4, %v772_v16  ;;  %v787_v49 = vshrl.u32 %v2228_v11, %v772_v16  ;;  %v786_v56 = vshll.u32 %v2227_v4, %v771_v7  ;;  %v3056_v5 = vpop.f32.mrb[7].mxu1 }
 0x19b   :  { %v1340_v57 = vshll.u32 %v1339_v30, 30  ;;  %v776_v21 = vor.u32 %v775_v9, %v774_v19  ;;  %v779_v15 = vor.u32 %v778_v13, %v777_v52  ;;  %v782_v36 = vor.u32 %v781_v23, %v780_v3 }
 0x19c   :  { %v529_v43 = vxor.u32 2147483648, %v528_v12  ;;  %v785_v20 = vor.u32 %v784_v44, %v783_v59  ;;  %vm789_vm0 = vcmp.lt.s32.totalorder %v3007_v27, 1  ;;  %vm792_vm1 = vcmp.lt.s32.totalorder %v3007_v27, 4 }
 0x19d   :  { %v3019_v17 = vsub.s32 %v1337_v37, %v1340_v57  ;;  %v3025_v34 = vadd.f32 %v2845_v6, %v2515_v28  ;;  %v788_v35 = vor.u32 %v787_v49, %v786_v56  ;;  %v797_v29 = vsel %vm789_vm0, %v776_v21, %v779_v15 }
 0x19e   :  { %v530_v46 = vsel %vm447_vm7, %v529_v43, %v528_v12  ;;  %v798_v1 = vsel %vm792_vm1, %v785_v20, 920167782  ;;  %vm790_vm2 = vcmp.lt.s32.totalorder %v3007_v27, 2  ;;  %vm791_vm3 = vcmp.lt.s32.totalorder %v3007_v27, 3 }
 0x19f   :  { %v533_v26 = vsel %vm2999_vm15, %v2677_v10, %v530_v46  ;;  %v1343_v22 = vsub.s32 0, %v3019_v17  ;;  %v1363_v28 = vsub.s32 4, %v1339_v30  ;;  %v773_v38 = vshrl.u32 %v2223_v58, %v772_v16 }
 0x1a0   :  { %2157 = vcosq.f32 %v533_v26  ;;  %v799_v40 = vsel %vm791_vm3, %v782_v36, %v798_v1  ;;  %v794_v61 = vsel %vm792_vm1, %v782_v36, 2102212464  ;;  %v801_v14 = vsel %vm789_vm0, %v779_v15, %v782_v36 }
 0x1a1   :  { %2159 = vsinq.f32 %v533_v26  ;;  %v1992_v60 = vmin.u32 %v1343_v22, %v3019_v17  ;;  %v800_v33 = vsel %vm790_vm2, %v797_v29, %v799_v40  ;;  %v802_v42 = vsel %vm792_vm1, %v788_v35, 1326507024 }
 0x1a2   :  { %v3052_v37 = vmul.u32.u64.low %v3005_v39, %v800_v33  ;;  %v3053_v7 = vmul.u32.u64.high %v3005_v39, %v800_v33, %v3052_v37  ;;  %v539_v53 = vand.u32 3, %v538_v47  ;;  %v793_v55 = vsel %vm789_vm0, %v773_v38, %v776_v21 }
 0x1a3   :  { %v1345_v25 = vclz %v1992_v60  ;;  %v795_v16 = vsel %vm791_vm3, %v779_v15, %v794_v61  ;;  %v803_v50 = vsel %vm791_vm3, %v785_v20, %v802_v42  ;;  %v1592_v19 = vand.u32 2139095040, %v3025_v34 }
 0x1a4   :  { %vm3067_vm4 = vcmp.le.f32.partialorder %v1277_v41, 0.7853982  ;;  %vm1279_vm5 = vcmp.lt.s32.totalorder %v2849_v54, 0  ;;  %v804_v9 = vsel %vm790_vm2, %v801_v14, %v803_v50  ;;  %v1589_v23 = vand.u32 2147483647, %v3025_v34 }
 0x1a5   :  { %v1993_v3 = vadd.s32 4294967294, %v1345_v25  ;;  %v1364_v13 = vsel %vm1279_vm5, %v1363_v28, %v1339_v30  ;;  %v3077_v59 = vmul.u32.u64.low %v3005_v39, %v804_v9  ;;  %v3078_v12 = vmul.u32.u64.high %v3005_v39, %v804_v9, %v3077_v59 }
 0x1a6   :  { %vm537_vm6 = vweird.f32 %v2677_v10  ;;  %v796_v41 = vsel %vm790_vm2, %v793_v55, %v795_v16  ;;  %v815_v44 = vadd.s32 1, %v3053_v7  ;;  %v1593_v49 = vshrl.u32 %v1592_v19, 23 }
 0x1a7   :  { %vm1994_vm7 = vcmp.lt.s32.totalorder %v1993_v3, 0  ;;  %vm540_vm8 = vcmp.lt.s32.totalorder %v539_v53, 2  ;;  %vm544_vm9 = vcmp.eq.s32.totalorder %v539_v53, 2  ;;  %v1333_v30 = vadd.s32 %v2967_v18, %v2973_v63 }
 0x1a8   :  { %v1348_v47 = vsel %vm1994_vm7, 0, %v1993_v3  ;;  %v1366_v15 = vsel %vm3067_vm4, 0, %v1364_v13  ;;  %v2003_v43 = vadd.s32 4294967169, %v1593_v49  ;;  %v812_v27 = vmul.u32 %v3005_v39, %v796_v41 }
 0x1a9   :  { %v1349_v57 = vsub.s32 32, %v1348_v47  ;;  %v1353_v21 = vsub.s32 4294967266, %v1348_v47  ;;  %v1350_v20 = vshll.u32 %v3019_v17, %v1348_v47  ;;  %vm814_vm10 = vc.u32 %v3078_v12, %v3052_v37 }
 0x1aa   :  { %v2158_v36 = vpop.eup %2157  ;;  %v1596_v56 = vand.u32 8388607, %v1589_v23  ;;  %v816_v29 = vsel %vm814_vm10, %v815_v44, %v3053_v7  ;;  %v1599_v22 = vadd.s32 1, %v2003_v43  ;;  %v3098_v17 = vadd.f32 %v2845_v6, %v2643_v51 }
 0x1ab   :  { %v2160_v46 = vpop.eup %2159  ;;  %v545_v18 = vxor.u32 2147483648, %v2158_v36  ;;  %v1351_v63 = vshrl.u32 %v1333_v30, %v1349_v57  ;;  %v1354_v35 = vadd.s32 127, %v1353_v21  ;;  %v817_v26 = vadd.s32 %v816_v29, %v812_v27 }
 0x1ac   :  { %v542_v1 = vxor.u32 2147483648, %v2160_v46  ;;  %vm541_vm11 = vcmp.eq.s32.totalorder %v539_v53, 0  ;;  %v1370_v60 = vadd.s32 3, %v1366_v15  ;;  %vm1600_vm12 = vcmp.gt.s32.totalorder %v1599_v22, 0 }
 0x1ad   :  { %v546_v39 = vsel %vm544_vm9, %v545_v18, %v2160_v46  ;;  %v1352_v28 = vor.u32 %v1351_v63, %v1350_v20  ;;  %v1355_v38 = vshll.u32 %v1354_v35, 23  ;;  %v818_v61 = vadd.s32 536870912, %v817_v26 }
 0x1ae   :  { %v543_v40 = vsel %vm541_vm11, %v2158_v36, %v542_v1  ;;  %v1597_v42 = vor.u32 8388608, %v1596_v56  ;;  %v1601_v7 = vsel %vm1600_vm12, %v1599_v22, 0  ;;  %v656_v16 = vand.u32 2139095040, %v3098_v17 }
 0x1af   :  { %v547_v33 = vsel %vm540_vm8, %v543_v40, %v546_v39  ;;  %v1356_v14 = vor.u32 4788187, %v1355_v38  ;;  %v819_v55 = vshrl.u32 %v818_v61, 30  ;;  %v1603_v51 = vand.u32 31, %v1601_v7 }
 0x1b0   :  { %v548_v25 = vsel %vm537_vm6, nan, %v547_v33  ;;  %v1359_v19 = vcvt.s32.f32 %v1352_v28  ;;  %vm759_vm13 = vcmp.lt.s32.totalorder %v2853_v31, 0  ;;  %v3106_v3 = vand.u32 3, %v1370_v60 }
 0x1b1   :  { %1903 = vst [vmem:[#allocation2 + $0x10] sm:$0xff] %v548_v25  ;;  %v1357_v50 = vand.u32 2147483647, %v1356_v14  ;;  %vm3110_vm14 = vcmp.le.f32.partialorder %v757_v24, 0.7853982  ;;  %v820_v9 = vshll.u32 %v819_v55, 30  ;;  %v813_v41 = vadd.s32 %v3052_v37, %v3078_v12 }
 0x1b2   :  { %v1604_v10 = vsub.s32 32, %v1603_v51  ;;  %v653_v13 = vand.u32 2147483647, %v3098_v17  ;;  %v843_v44 = vsub.s32 4, %v819_v55  ;;  %v3117_v49 = vshll.u32 %v1597_v42, 8 }
 0x1b3   :  { %v1360_v59 = vmul.f32 %v1359_v19, %v1357_v50  ;;  %v3119_v30 = vsub.s32 %v817_v26, %v820_v9  ;;  %v3121_v47 = vshrl.u32 %v1601_v7, 5  ;;  %v657_v57 = vshrl.u32 %v656_v16, 23 }
 0x1b4   :  { %v1607_v24 = vshrl.u32 %v2224_v62, %v1604_v10  ;;  %v1606_v15 = vshll.u32 %v2223_v58, %v1603_v51  ;;  %v1610_v43 = vshrl.u32 %v2225_v0, %v1604_v10  ;;  %v1613_v36 = vshrl.u32 %v2226_v2, %v1604_v10 }
 0x1b5   :  { %v1361_v21 = vxor.u32 2147483648, %v1360_v59  ;;  %v823_v20 = vsub.s32 0, %v3119_v30  ;;  %v1609_v37 = vshll.u32 %v2224_v62, %v1603_v51  ;;  %v1612_v12 = vshll.u32 %v2225_v0, %v1603_v51 }
 0x1b6   :  { %v1616_v27 = vshrl.u32 %v2227_v4, %v1604_v10  ;;  %v844_v46 = vsel %vm759_vm13, %v843_v44, %v819_v55  ;;  %v1608_v18 = vor.u32 %v1607_v24, %v1606_v15  ;;  %v1615_v63 = vshll.u32 %v2226_v2, %v1603_v51 }
 0x1b7   :  { %v1362_v56 = vsel %vm1279_vm5, %v1361_v21, %v1360_v59  ;;  %v1972_v29 = vmin.u32 %v823_v20, %v3119_v30  ;;  %v1611_v1 = vor.u32 %v1610_v43, %v1609_v37  ;;  %v1614_v26 = vor.u32 %v1613_v36, %v1612_v12 }
 0x1b8   :  { %v1365_v35 = vsel %vm3067_vm4, %v2849_v54, %v1362_v56  ;;  %v1617_v22 = vor.u32 %v1616_v27, %v1615_v63  ;;  %v1618_v39 = vshll.u32 %v2227_v4, %v1603_v51  ;;  %v1619_v28 = vshrl.u32 %v2228_v11, %v1604_v10 }
 0x1b9   :  { %2161 = vcosq.f32 %v1365_v35  ;;  %v825_v38 = vclz %v1972_v29  ;;  %v1967_v40 = vadd.s32 4294967169, %v657_v57  ;;  %v3144_v60 = vand.u32 8388607, %v653_v13 }
 0x1ba   :  { %2163 = vsinq.f32 %v1365_v35  ;;  %v846_v52 = vsel %vm3110_vm14, 0, %v844_v46  ;;  %v1605_v61 = vshrl.u32 %v2223_v58, %v1604_v10  ;;  %v1620_v33 = vor.u32 %v1619_v28, %v1618_v39 }
 0x1bb   :  { %vm1621_vm15 = vcmp.lt.s32.totalorder %v3121_v47, 1  ;;  %v1973_v14 = vadd.s32 4294967294, %v825_v38  ;;  %vm1623_vm0 = vcmp.lt.s32.totalorder %v3121_v47, 3  ;;  %vm1624_vm1 = vcmp.lt.s32.totalorder %v3121_v47, 4 }
 0x1bc   :  { %v1629_v42 = vsel %vm1621_vm15, %v1608_v18, %v1611_v1  ;;  %v1626_v7 = vsel %vm1624_vm1, %v1614_v26, 2102212464  ;;  %v1630_v25 = vsel %vm1624_vm1, %v1617_v22, 920167782  ;;  %v1633_v55 = vsel %vm1621_vm15, %v1611_v1, %v1614_v26 }
 0x1bd   :  { %v1634_v51 = vsel %vm1624_vm1, %v1620_v33, 1326507024  ;;  %vm1974_vm2 = vcmp.lt.s32.totalorder %v1973_v14, 0  ;;  %vm1622_vm3 = vcmp.lt.s32.totalorder %v3121_v47, 2  ;;  %v1631_v16 = vsel %vm1623_vm0, %v1614_v26, %v1630_v25 }
 0x1be   :  { %v1635_v50 = vsel %vm1623_vm0, %v1617_v22, %v1634_v51  ;;  %vm1372_vm4 = vcmp.lt.s32.totalorder %v3106_v3, 2  ;;  %v828_v19 = vsel %vm1974_vm2, 0, %v1973_v14  ;;  %v1625_v9 = vsel %vm1621_vm15, %v1605_v61, %v1608_v18 }
 0x1bf   :  { %v1632_v10 = vsel %vm1622_vm3, %v1629_v42, %v1631_v16  ;;  %v1636_v59 = vsel %vm1622_vm3, %v1633_v55, %v1635_v50  ;;  %vm1369_vm5 = vweird.f32 %v2849_v54  ;;  %v829_v44 = vsub.s32 32, %v828_v19 }
 0x1c0   :  { %v833_v24 = vsub.s32 4294967266, %v828_v19  ;;  %v1627_v57 = vsel %vm1623_vm0, %v1611_v1, %v1626_v7  ;;  %v663_v21 = vadd.s32 1, %v1967_v40  ;;  %v830_v37 = vshll.u32 %v3119_v30, %v828_v19 }
 0x1c1   :  { %v3166_v15 = vmul.u32.u64.low %v3117_v49, %v1636_v59  ;;  %v3167_v43 = vmul.u32.u64.high %v3117_v49, %v1636_v59, %v3166_v15  ;;  %v3170_v36 = vmul.u32.u64.low %v3117_v49, %v1632_v10  ;;  %v3171_v20 = vmul.u32.u64.high %v3117_v49, %v1632_v10, %v3170_v36 }
 0x1c2   :  { %v831_v12 = vshrl.u32 %v813_v41, %v829_v44  ;;  %v834_v27 = vadd.s32 127, %v833_v24  ;;  %vm664_vm6 = vcmp.gt.s32.totalorder %v663_v21, 0  ;;  %vm1373_vm7 = vcmp.eq.s32.totalorder %v3106_v3, 0 }
 0x1c3   :  { %v2162_v56 = vpop.eup %2161  ;;  %vm1376_vm8 = vcmp.eq.s32.totalorder %v3106_v3, 2  ;;  %v1628_v46 = vsel %vm1622_vm3, %v1625_v9, %v1627_v57  ;;  %v665_v18 = vsel %vm664_vm6, %v663_v21, 0  ;;  %v661_v26 = vor.u32 8388608, %v3144_v60 }
 0x1c4   :  { %v2164_v63 = vpop.eup %2163  ;;  %v1377_v35 = vxor.u32 2147483648, %v2162_v56  ;;  %v832_v29 = vor.u32 %v831_v12, %v830_v37  ;;  %v835_v1 = vshll.u32 %v834_v27, 23  ;;  %v850_v30 = vadd.s32 3, %v846_v52 }
 0x1c5   :  { %v1374_v22 = vxor.u32 2147483648, %v2164_v63  ;;  %vm1646_vm9 = vc.u32 %v3167_v43, %v3170_v36  ;;  %v1647_v41 = vadd.s32 1, %v3171_v20  ;;  %v1644_v38 = vmul.u32 %v3117_v49, %v1628_v46 }
 0x1c6   :  { %v1378_v39 = vsel %vm1376_vm8, %v1377_v35, %v2164_v63  ;;  %v836_v28 = vor.u32 4788187, %v835_v1  ;;  %v667_v47 = vand.u32 31, %v665_v18  ;;  %v839_v61 = vcvt.s32.f32 %v832_v29 }
 0x1c7   :  { %v1375_v40 = vsel %vm1373_vm7, %v2162_v56, %v1374_v22  ;;  %v1648_v33 = vsel %vm1646_vm9, %v1647_v41, %v3171_v20  ;;  %v3189_v60 = vadd.f32 %v2845_v6, %v2709_v45  ;;  %v3195_v25 = vand.u32 3, %v850_v30 }
 0x1c8   :  { %v1379_v52 = vsel %vm1372_vm4, %v1375_v40, %v1378_v39  ;;  %v837_v14 = vand.u32 2147483647, %v836_v28  ;;  %v1649_v42 = vadd.s32 %v1648_v33, %v1644_v38  ;;  %v668_v7 = vsub.s32 32, %v667_v47 }
 0x1c9   :  { %v1380_v49 = vsel %vm1369_vm5, nan, %v1379_v52  ;;  %v666_v55 = vshrl.u32 %v665_v18, 5  ;;  %v670_v51 = vshll.u32 %v2223_v58, %v667_v47  ;;  %v673_v19 = vshll.u32 %v2224_v62, %v667_v47 }
 0x1ca   :  { %1911 = vst [vmem:[#allocation2 + $0x50] sm:$0xff] %v1380_v49  ;;  %v840_v16 = vmul.f32 %v839_v61, %v837_v14  ;;  %v1650_v50 = vadd.s32 536870912, %v1649_v42  ;;  %v671_v45 = vshrl.u32 %v2224_v62, %v668_v7  ;;  %v674_v3 = vshrl.u32 %v2225_v0, %v668_v7 }
 0x1cb   :  { %v676_v9 = vshll.u32 %v2225_v0, %v667_v47  ;;  %v677_v10 = vshrl.u32 %v2226_v2, %v668_v7  ;;  %v680_v54 = vshrl.u32 %v2227_v4, %v668_v7  ;;  %v679_v57 = vshll.u32 %v2226_v2, %v667_v47 }
 0x1cc   :  { %v841_v59 = vxor.u32 2147483648, %v840_v16  ;;  %v1651_v44 = vshrl.u32 %v1650_v50, 30  ;;  %v672_v24 = vor.u32 %v671_v45, %v670_v51  ;;  %v675_v21 = vor.u32 %v674_v3, %v673_v19 }
 0x1cd   :  { %v678_v15 = vor.u32 %v677_v10, %v676_v9  ;;  %v682_v20 = vshll.u32 %v2227_v4, %v667_v47  ;;  %v683_v37 = vshrl.u32 %v2228_v11, %v668_v7  ;;  %v681_v56 = vor.u32 %v680_v54, %v679_v57 }
 0x1ce   :  { %v842_v12 = vsel %vm759_vm13, %v841_v59, %v840_v16  ;;  %v1652_v27 = vshll.u32 %v1651_v44, 30  ;;  %v3209_v46 = vshll.u32 %v661_v26, 8  ;;  %vm685_vm10 = vcmp.lt.s32.totalorder %v666_v55, 1 }
 0x1cf   :  { %v845_v18 = vsel %vm3110_vm14, %v2853_v31, %v842_v12  ;;  %v684_v63 = vor.u32 %v683_v37, %v682_v20  ;;  %v1488_v35 = vand.u32 2139095040, %v3189_v60  ;;  %vm686_vm11 = vcmp.lt.s32.totalorder %v666_v55, 2 }
 0x1d0   :  { %2165 = vcosq.f32 %v845_v18  ;;  %v3215_v29 = vsub.s32 %v1649_v42, %v1652_v27  ;;  %vm688_vm12 = vcmp.lt.s32.totalorder %v666_v55, 4  ;;  %v669_v1 = vshrl.u32 %v2223_v58, %v668_v7 }
 0x1d1   :  { %2167 = vsinq.f32 %v845_v18  ;;  %v690_v22 = vsel %vm688_vm12, %v678_v15, 2102212464  ;;  %v693_v26 = vsel %vm685_vm10, %v672_v24, %v675_v21  ;;  %v1675_v41 = vsub.s32 4, %v1651_v44 }
 0x1d2   :  { %v1655_v30 = vsub.s32 0, %v3215_v29  ;;  %vm687_vm13 = vcmp.lt.s32.totalorder %v666_v55, 3  ;;  %v694_v53 = vsel %vm688_vm12, %v681_v56, 920167782  ;;  %v689_v39 = vsel %vm685_vm10, %v669_v1, %v672_v24 }
 0x1d3   :  { %v695_v28 = vsel %vm687_vm13, %v678_v15, %v694_v53  ;;  %v697_v38 = vsel %vm685_vm10, %v675_v21, %v678_v15  ;;  %v698_v47 = vsel %vm688_vm12, %v684_v63, 1326507024  ;;  %v691_v61 = vsel %vm687_vm13, %v675_v21, %v690_v22 }
 0x1d4   :  { %v2004_v40 = vmin.u32 %v1655_v30, %v3215_v29  ;;  %v696_v33 = vsel %vm686_vm11, %v693_v26, %v695_v28  ;;  %v699_v52 = vsel %vm687_vm13, %v681_v56, %v698_v47  ;;  %vm1591_vm14 = vcmp.lt.s32.totalorder %v3025_v34, 0 }
 0x1d5   :  { %v700_v14 = vsel %vm686_vm11, %v697_v38, %v699_v52  ;;  %v3227_v42 = vmul.u32.u64.low %v3209_v46, %v696_v33  ;;  %v3228_v7 = vmul.u32.u64.high %v3209_v46, %v696_v33, %v3227_v42  ;;  %v1676_v51 = vsel %vm1591_vm14, %v1675_v41, %v1651_v44 }
 0x1d6   :  { %v1657_v49 = vclz %v2004_v40  ;;  %v1485_v16 = vand.u32 2147483647, %v3189_v60  ;;  %v692_v50 = vsel %vm686_vm11, %v689_v39, %v691_v61  ;;  %v1489_v3 = vshrl.u32 %v1488_v35, 23 }
 0x1d7   :  { %v3235_v45 = vmul.u32.u64.low %v3209_v46, %v700_v14  ;;  %v3236_v19 = vmul.u32.u64.high %v3209_v46, %v700_v14, %v3235_v45  ;;  %vm852_vm15 = vcmp.lt.s32.totalorder %v3195_v25, 2  ;;  %vm3241_vm0 = vcmp.le.f32.partialorder %v1589_v23, 0.7853982 }
 0x1d8   :  { %v2005_v10 = vadd.s32 4294967294, %v1657_v49  ;;  %v3247_v54 = vadd.f32 %v2845_v6, %v2835_v48  ;;  %vm853_vm1 = vcmp.eq.s32.totalorder %v3195_v25, 0  ;;  %vm856_vm2 = vcmp.eq.s32.totalorder %v3195_v25, 2 }
 0x1d9   :  { %v711_v55 = vadd.s32 1, %v3228_v7  ;;  %v1999_v59 = vadd.s32 4294967169, %v1489_v3  ;;  %v1645_v24 = vadd.s32 %v3170_v36, %v3167_v43  ;;  %v1678_v23 = vsel %vm3241_vm0, 0, %v1676_v51 }
 0x1da   :  { %v2166_v44 = vpop.eup %2165  ;;  %vm2006_vm3 = vcmp.lt.s32.totalorder %v2005_v10, 0  ;;  %v708_v57 = vmul.u32 %v3209_v46, %v692_v50  ;;  %vm710_vm4 = vc.u32 %v3236_v19, %v3227_v42  ;;  %v1492_v15 = vand.u32 8388607, %v1485_v16 }
 0x1db   :  { %v2168_v21 = vpop.eup %2167  ;;  %v857_v48 = vxor.u32 2147483648, %v2166_v44  ;;  %v1660_v6 = vsel %vm2006_vm3, 0, %v2005_v10  ;;  %v968_v27 = vand.u32 2139095040, %v3247_v54  ;;  %v712_v56 = vsel %vm710_vm4, %v711_v55, %v3228_v7 }
 0x1dc   :  { %v854_v20 = vxor.u32 2147483648, %v2168_v21  ;;  %v1661_v37 = vsub.s32 32, %v1660_v6  ;;  %v1665_v12 = vsub.s32 4294967266, %v1660_v6  ;;  %v1662_v36 = vshll.u32 %v3215_v29, %v1660_v6 }
 0x1dd   :  { %v858_v43 = vsel %vm856_vm2, %v857_v48, %v2168_v21  ;;  %v1495_v46 = vadd.s32 1, %v1999_v59  ;;  %v713_v1 = vadd.s32 %v712_v56, %v708_v57  ;;  %vm849_vm5 = vweird.f32 %v2853_v31 }
 0x1de   :  { %v855_v18 = vsel %vm853_vm1, %v2166_v44, %v854_v20  ;;  %v1663_v63 = vshrl.u32 %v1645_v24, %v1661_v37  ;;  %v1666_v35 = vadd.s32 127, %v1665_v12  ;;  %v1682_v26 = vadd.s32 3, %v1678_v23 }
 0x1df   :  { %v859_v22 = vsel %vm852_vm15, %v855_v18, %v858_v43  ;;  %vm1496_vm6 = vcmp.gt.s32.totalorder %v1495_v46, 0  ;;  %v714_v29 = vadd.s32 536870912, %v713_v1  ;;  %v1493_v39 = vor.u32 8388608, %v1492_v15 }
 0x1e0   :  { %v860_v30 = vsel %vm849_vm5, nan, %v859_v22  ;;  %v1664_v41 = vor.u32 %v1663_v63, %v1662_v36  ;;  %v1667_v53 = vshll.u32 %v1666_v35, 23  ;;  %v1497_v28 = vsel %vm1496_vm6, %v1495_v46, 0 }
 0x1e1   :  { %1906 = vst [vmem:[#allocation2 + $0x28] sm:$0xff] %v860_v30  ;;  %v715_v47 = vshrl.u32 %v714_v29, 30  ;;  %v969_v40 = vshrl.u32 %v968_v27, 23  ;;  %v1499_v61 = vand.u32 31, %v1497_v28  ;;  %v3270_v14 = vand.u32 3, %v1682_v26 }
 0x1e2   :  { %v1668_v38 = vor.u32 4788187, %v1667_v53  ;;  %v1671_v52 = vcvt.s32.f32 %v1664_v41  ;;  %vm655_vm7 = vcmp.lt.s32.totalorder %v3098_v17, 0  ;;  %v709_v25 = vadd.s32 %v3227_v42, %v3236_v19 }
 0x1e3   :  { %v716_v31 = vshll.u32 %v715_v47, 30  ;;  %v1500_v7 = vsub.s32 32, %v1499_v61  ;;  %v3274_v49 = vshll.u32 %v1493_v39, 8  ;;  %v965_v51 = vand.u32 2147483647, %v3247_v54 }
 0x1e4   :  { %v1669_v33 = vand.u32 2147483647, %v1668_v38  ;;  %v1498_v3 = vshrl.u32 %v1497_v28, 5  ;;  %v1979_v10 = vadd.s32 4294967169, %v969_v40  ;;  %v739_v55 = vsub.s32 4, %v715_v47 }
 0x1e5   :  { %v3277_v45 = vsub.s32 %v713_v1, %v716_v31  ;;  %v1502_v59 = vshll.u32 %v2223_v58, %v1499_v61  ;;  %v1503_v44 = vshrl.u32 %v2224_v62, %v1500_v7  ;;  %v1506_v24 = vshrl.u32 %v2225_v0, %v1500_v7 }
 0x1e6   :  { %v1672_v50 = vmul.f32 %v1671_v52, %v1669_v33  ;;  %vm3284_vm8 = vcmp.le.f32.partialorder %v653_v13, 0.7853982  ;;  %v1505_v57 = vshll.u32 %v2224_v62, %v1499_v61  ;;  %v1509_v21 = vshrl.u32 %v2226_v2, %v1500_v7 }
 0x1e7   :  { %v719_v19 = vsub.s32 0, %v3277_v45  ;;  %v1504_v48 = vor.u32 %v1503_v44, %v1502_v59  ;;  %v1508_v6 = vshll.u32 %v2225_v0, %v1499_v61  ;;  %v1511_v15 = vshll.u32 %v2226_v2, %v1499_v61 }
 0x1e8   :  { %v1673_v23 = vxor.u32 2147483648, %v1672_v50  ;;  %v1512_v20 = vshrl.u32 %v2227_v4, %v1500_v7  ;;  %v1507_v12 = vor.u32 %v1506_v24, %v1505_v57  ;;  %v1514_v27 = vshll.u32 %v2227_v4, %v1499_v61 }
 0x1e9   :  { %v1968_v13 = vmin.u32 %v719_v19, %v3277_v45  ;;  %v1510_v36 = vor.u32 %v1509_v21, %v1508_v6  ;;  %v1515_v46 = vshrl.u32 %v2228_v11, %v1500_v7  ;;  %vm1517_vm9 = vcmp.lt.s32.totalorder %v1498_v3, 1 }
 0x1ea   :  { %v1674_v37 = vsel %vm1591_vm14, %v1673_v23, %v1672_v50  ;;  %v1513_v56 = vor.u32 %v1512_v20, %v1511_v15  ;;  %v975_v63 = vadd.s32 1, %v1979_v10  ;;  %v740_v35 = vsel %vm655_vm7, %v739_v55, %v715_v47 }
 0x1eb   :  { %v1677_v43 = vsel %vm3241_vm0, %v3025_v34, %v1674_v37  ;;  %v721_v18 = vclz %v1968_v13  ;;  %v1501_v1 = vshrl.u32 %v2223_v58, %v1500_v7  ;;  %v1516_v22 = vor.u32 %v1515_v46, %v1514_v27 }
 0x1ec   :  { %2169 = vcosq.f32 %v1677_v43  ;;  %vm1519_vm10 = vcmp.lt.s32.totalorder %v1498_v3, 3  ;;  %vm1520_vm11 = vcmp.lt.s32.totalorder %v1498_v3, 4  ;;  %v1525_v9 = vsel %vm1517_vm9, %v1504_v48, %v1507_v12 }
 0x1ed   :  { %2171 = vsinq.f32 %v1677_v43  ;;  %v1969_v26 = vadd.s32 4294967294, %v721_v18  ;;  %v1522_v30 = vsel %vm1520_vm11, %v1510_v36, 2102212464  ;;  %v1526_v41 = vsel %vm1520_vm11, %v1513_v56, 920167782 }
 0x1ee   :  { %v1529_v53 = vsel %vm1517_vm9, %v1507_v12, %v1510_v36  ;;  %v1530_v29 = vsel %vm1520_vm11, %v1516_v22, 1326507024  ;;  %vm1518_vm13 = vcmp.lt.s32.totalorder %v1498_v3, 2  ;;  %v1527_v39 = vsel %vm1519_vm10, %v1510_v36, %v1526_v41  ;;  %v3340_v18 = vld [vmem:[%s3635_s2] ss:$0 sm:$0xff]  ;;  %s2229_s2 = smov [#allocation2]  }
 0x1ef   :  { %vm1970_vm12 = vcmp.lt.s32.totalorder %v1969_v26, 0  ;;  %v1531_v28 = vsel %vm1519_vm10, %v1513_v56, %v1530_v29  ;;  %v742_v47 = vsel %vm3284_vm8, 0, %v740_v35  ;;  %v1528_v40 = vsel %vm1518_vm13, %v1525_v9, %v1527_v39  ;;  %s1922_s22 = sshll.u32 %s2229_s2, 4  ;;  %s1923_s22 = int_to_ptr.vmem [resolvable:$true] %s1922_s22 }
 0x1f0   :  { %v724_v38 = vsel %vm1970_vm12, 0, %v1969_v26  ;;  %v1532_v61 = vsel %vm1518_vm13, %v1529_v53, %v1531_v28  ;;  %vm1684_vm14 = vcmp.lt.s32.totalorder %v3270_v14, 2  ;;  %v1521_v31 = vsel %vm1517_vm9, %v1501_v1, %v1504_v48  ;;  %s2199_s23 = scalar_lea.vmem %s1923_s22, 2048  ;;  %p2204_p1 = scmp.lt.s32.totalorder %s1923_s22, %s1923_s22 }
 0x1f1   :  { %v725_v33 = vsub.s32 32, %v724_v38  ;;  %v729_v52 = vsub.s32 4294967266, %v724_v38  ;;  %v1523_v7 = vsel %vm1519_vm10, %v1507_v12, %v1522_v30  ;;  %vm1681_vm15 = vweird.f32 %v3025_v34  ;;  %p2200_p0 = scmp.ne.s32.totalorder %s1923_s22, %s2199_s23  ;;  %p2205_p2 = scmp.lt.s32.totalorder %s2199_s23, %s2199_s23 }
 0x1f2   :  { %v3318_v50 = vmul.u32.u64.low %v3274_v49, %v1532_v61  ;;  %v3319_v10 = vmul.u32.u64.high %v3274_v49, %v1532_v61, %v3318_v50  ;;  %v3322_v55 = vmul.u32.u64.low %v3274_v49, %v1528_v40  ;;  %v3323_v59 = vmul.u32.u64.high %v3274_v49, %v1528_v40, %v3322_v55 }
 0x1f3   :  { %v726_v44 = vshll.u32 %v3277_v45, %v724_v38  ;;  %v727_v24 = vshrl.u32 %v709_v25, %v725_v33  ;;  %v730_v23 = vadd.s32 127, %v729_v52  ;;  %vm976_vm0 = vcmp.gt.s32.totalorder %v975_v63, 0  ;;  %p2206_p3 = por %p2205_p2, %p2204_p1 }
 0x1f4   :  { %vm1685_vm1 = vcmp.eq.s32.totalorder %v3270_v14, 0  ;;  %v1524_v19 = vsel %vm1518_vm13, %v1521_v31, %v1523_v7  ;;  %v972_v57 = vand.u32 8388607, %v965_v51  ;;  %v977_v21 = vsel %vm976_vm0, %v975_v63, 0 }
 0x1f5   :  { %vm1688_vm2 = vcmp.eq.s32.totalorder %v3270_v14, 2  ;;  %v728_v6 = vor.u32 %v727_v24, %v726_v44  ;;  %v731_v15 = vshll.u32 %v730_v23, 23  ;;  %v979_v20 = vand.u32 31, %v977_v21  ;;  %p2207_p4 = pnand %p2206_p3, %p2200_p0 }
 0x1f6   :  { %v2170_v48 = vpop.eup %2169  ;;  %v746_v45 = vadd.s32 3, %v742_v47  ;;  %vm1542_vm3 = vc.u32 %v3319_v10, %v3322_v55  ;;  %v1543_v25 = vadd.s32 1, %v3323_v59  ;;  %v1540_v27 = vmul.u32 %v3274_v49, %v1524_v19 }
 0x1f7   :  { %v2172_v37 = vpop.eup %2171  ;;  %v1689_v13 = vxor.u32 2147483648, %v2170_v48  ;;  %v732_v12 = vor.u32 4788187, %v731_v15  ;;  %v980_v43 = vsub.s32 32, %v979_v20  ;;  %v973_v46 = vor.u32 8388608, %v972_v57 }
 0x1f8   :  { %v1686_v3 = vxor.u32 2147483648, %v2172_v37  ;;  %v1544_v56 = vsel %vm1542_vm3, %v1543_v25, %v3323_v59  ;;  %v3344_v63 = vadd.f32 %v3340_v18, %v2883_v8  ;;  %v735_v22 = vcvt.s32.f32 %v728_v6 }
 0x1f9   :  { %v1690_v36 = vsel %vm1688_vm2, %v1689_v13, %v2172_v37  ;;  %v733_v1 = vand.u32 2147483647, %v732_v12  ;;  %v1545_v49 = vadd.s32 %v1544_v56, %v1540_v27  ;;  %v3350_v9 = vand.u32 3, %v746_v45 }
 0x1fa   :  { %v1687_v35 = vsel %vm1685_vm1, %v2170_v48, %v1686_v3  ;;  %v983_v30 = vshrl.u32 %v2224_v62, %v980_v43  ;;  %v986_v41 = vshrl.u32 %v2225_v0, %v980_v43  ;;  %v978_v39 = vshrl.u32 %v977_v21, 5 }
 0x1fb   :  { %v1691_v26 = vsel %vm1684_vm14, %v1687_v35, %v1690_v36  ;;  %v736_v8 = vmul.f32 %v735_v22, %v733_v1  ;;  %v1546_v29 = vadd.s32 536870912, %v1545_v49  ;;  %vm1487_vm4 = vcmp.lt.s32.totalorder %v3189_v60, 0 }
 0x1fc   :  { %v1692_v53 = vsel %vm1681_vm15, nan, %v1691_v26  ;;  %v982_v28 = vshll.u32 %v2223_v58, %v979_v20  ;;  %v985_v14 = vshll.u32 %v2224_v62, %v979_v20  ;;  %v989_v38 = vshrl.u32 %v2226_v2, %v980_v43 }
 0x1fd   :  { %1914 = vst [vmem:[#allocation2 + $0x68] sm:$0xff] %v1692_v53  ;;  %v992_v47 = vshrl.u32 %v2227_v4, %v980_v43  ;;  %v737_v40 = vxor.u32 2147483648, %v736_v8  ;;  %v1547_v61 = vshrl.u32 %v1546_v29, 30  ;;  %v988_v33 = vshll.u32 %v2225_v0, %v979_v20 }
 0x1fe   :  { %v991_v34 = vshll.u32 %v2226_v2, %v979_v20  ;;  %v984_v52 = vor.u32 %v983_v30, %v982_v28  ;;  %v987_v31 = vor.u32 %v986_v41, %v985_v14  ;;  %v994_v7 = vshll.u32 %v2227_v4, %v979_v20 }
 0x1ff   :  { %v995_v50 = vshrl.u32 %v2228_v11, %v980_v43  ;;  %v738_v59 = vsel %vm655_vm7, %v737_v40, %v736_v8  ;;  %v1548_v44 = vshll.u32 %v1547_v61, 30  ;;  %v3367_v23 = vshll.u32 %v973_v46, 8 }
 0x200   :  { %v993_v24 = vor.u32 %v992_v47, %v991_v34  ;;  %v741_v19 = vsel %vm3284_vm8, %v3098_v17, %v738_v59  ;;  %v990_v57 = vor.u32 %v989_v38, %v988_v33  ;;  %v1800_v48 = vand.u32 2139095040, %v3344_v63 }
 0x201   :  { %v996_v21 = vor.u32 %v995_v50, %v994_v7  ;;  %2173 = vcosq.f32 %v741_v19  ;;  %v3373_v6 = vsub.s32 %v1545_v49, %v1548_v44  ;;  %v1571_v15 = vsub.s32 4, %v1547_v61 }
 0x202   :  { %vm997_vm5 = vcmp.lt.s32.totalorder %v978_v39, 1  ;;  %2175 = vsinq.f32 %v741_v19  ;;  %v981_v20 = vshrl.u32 %v2223_v58, %v980_v43  ;;  %vm1000_vm6 = vcmp.lt.s32.totalorder %v978_v39, 4 }
 0x203   :  { %v1005_v37 = vsel %vm997_vm5, %v984_v52, %v987_v31  ;;  %v1551_v13 = vsub.s32 0, %v3373_v6  ;;  %vm998_vm7 = vcmp.lt.s32.totalorder %v978_v39, 2  ;;  %vm999_vm9 = vcmp.lt.s32.totalorder %v978_v39, 3 }
 0x204   :  { %v1006_v42 = vsel %vm1000_vm6, %v993_v24, 920167782  ;;  %v1002_v45 = vsel %vm1000_vm6, %v990_v57, 2102212464  ;;  %v1009_v3 = vsel %vm997_vm5, %v987_v31, %v990_v57  ;;  %v1010_v12 = vsel %vm1000_vm6, %v996_v21, 1326507024 }
 0x205   :  { %v1007_v25 = vsel %vm999_vm9, %v990_v57, %v1006_v42  ;;  %v2000_v27 = vmin.u32 %v1551_v13, %v3373_v6  ;;  %v1572_v36 = vsel %vm1487_vm4, %v1571_v15, %v1547_v61  ;;  %v1011_v56 = vsel %vm999_vm9, %v993_v24, %v1010_v12 }
 0x206   :  { %v1008_v43 = vsel %vm998_vm7, %v1005_v37, %v1007_v25  ;;  %v1012_v46 = vsel %vm998_vm7, %v1009_v3, %v1011_v56  ;;  %v1801_v22 = vshrl.u32 %v1800_v48, 23  ;;  %v1001_v26 = vsel %vm997_vm5, %v981_v20, %v984_v52 }
 0x207   :  { %v3385_v35 = vmul.u32.u64.low %v3367_v23, %v1008_v43  ;;  %v3386_v1 = vmul.u32.u64.high %v3367_v23, %v1008_v43, %v3385_v35  ;;  %v1553_v49 = vclz %v2000_v27  ;;  %v1003_v30 = vsel %vm999_vm9, %v987_v31, %v1002_v45 }
 0x208   :  { %vm745_vm8 = vweird.f32 %v3098_v17  ;;  %vm3392_vm10 = vcmp.le.f32.partialorder %v1485_v16, 0.7853982  ;;  %v3397_v53 = vmul.u32.u64.low %v3367_v23, %v1012_v46  ;;  %v3398_v8 = vmul.u32.u64.high %v3367_v23, %v1012_v46, %v3397_v53 }
 0x209   :  { %v2011_v29 = vadd.s32 4294967169, %v1801_v22  ;;  %v2001_v28 = vadd.s32 4294967294, %v1553_v49  ;;  %v1574_v14 = vsel %vm3392_vm10, 0, %v1572_v36  ;;  %v1797_v38 = vand.u32 2147483647, %v3344_v63 }
 0x20a   :  { %v3405_v47 = vadd.f32 %v3340_v18, %v2975_v32  ;;  %vm748_vm11 = vcmp.lt.s32.totalorder %v3350_v9, 2  ;;  %v1004_v16 = vsel %vm998_vm7, %v1001_v26, %v1003_v30  ;;  %v1023_v40 = vadd.s32 1, %v3386_v1 }
 0x20b   :  { %v1807_v61 = vadd.s32 1, %v2011_v29  ;;  %v2174_v33 = vpop.eup %2173  ;;  %vm749_vm12 = vcmp.eq.s32.totalorder %v3350_v9, 0  ;;  %vm752_vm13 = vcmp.eq.s32.totalorder %v3350_v9, 2  ;;  %v1541_v34 = vadd.s32 %v3322_v55, %v3319_v10 }
 0x20c   :  { %vm2002_vm14 = vcmp.lt.s32.totalorder %v2001_v28, 0  ;;  %v2176_v52 = vpop.eup %2175  ;;  %v753_v31 = vxor.u32 2147483648, %v2174_v33  ;;  %v1578_v7 = vadd.s32 3, %v1574_v14  ;;  %vm1022_vm15 = vc.u32 %v3398_v8, %v3385_v35 }
 0x20d   :  { %v1556_v32 = vsel %vm2002_vm14, 0, %v2001_v28  ;;  %v750_v39 = vxor.u32 2147483648, %v2176_v52  ;;  %v1020_v44 = vmul.u32 %v3367_v23, %v1004_v16  ;;  %v1024_v57 = vsel %vm1022_vm15, %v1023_v40, %v3386_v1 }
 0x20e   :  { %v1557_v50 = vsub.s32 32, %v1556_v32  ;;  %v1561_v59 = vsub.s32 4294967266, %v1556_v32  ;;  %v754_v24 = vsel %vm752_vm13, %v753_v31, %v2176_v52  ;;  %v1558_v19 = vshll.u32 %v3373_v6, %v1556_v32 }
 0x20f   :  { %vm1808_vm0 = vcmp.gt.s32.totalorder %v1807_v61, 0  ;;  %v751_v10 = vsel %vm749_vm12, %v2174_v33, %v750_v39  ;;  %v1025_v48 = vadd.s32 %v1024_v57, %v1020_v44  ;;  %v1804_v20 = vand.u32 8388607, %v1797_v38 }
 0x210   :  { %v1559_v55 = vshrl.u32 %v1541_v34, %v1557_v50  ;;  %v1562_v21 = vadd.s32 127, %v1561_v59  ;;  %v755_v15 = vsel %vm748_vm11, %v751_v10, %v754_v24  ;;  %v1809_v37 = vsel %vm1808_vm0, %v1807_v61, 0 }
 0x211   :  { %v861_v23 = vand.u32 2147483647, %v3405_v47  ;;  %v756_v6 = vsel %vm745_vm8, nan, %v755_v15  ;;  %v1026_v45 = vadd.s32 536870912, %v1025_v48  ;;  %v1811_v25 = vand.u32 31, %v1809_v37 }
 0x212   :  { %v1560_v13 = vor.u32 %v1559_v55, %v1558_v19  ;;  %v1563_v42 = vshll.u32 %v1562_v21, 23  ;;  %1905 = vst [vmem:[#allocation2 + $0x20] sm:$0xff] %v756_v6  ;;  %v3429_v27 = vand.u32 3, %v1578_v7  ;;  %v1805_v9 = vor.u32 8388608, %v1804_v20 }
 0x213   :  { %v3427_v12 = vshrl.u32 %v1026_v45, 30  ;;  %v1812_v36 = vsub.s32 32, %v1811_v25  ;;  %v864_v43 = vand.u32 2139095040, %v3405_v47  ;;  %v3435_v17 = vand.u32 8388607, %v861_v23 }
 0x214   :  { %v1564_v3 = vor.u32 4788187, %v1563_v42  ;;  %v1567_v46 = vcvt.s32.f32 %v1560_v13  ;;  %v1021_v22 = vadd.s32 %v3385_v35, %v3398_v8  ;;  %v1814_v28 = vshll.u32 %v2223_v58, %v1811_v25 }
 0x215   :  { %v1028_v1 = vshll.u32 %v3427_v12, 30  ;;  %v1815_v49 = vshrl.u32 %v2224_v62, %v1812_v36  ;;  %v1818_v26 = vshrl.u32 %v2225_v0, %v1812_v36  ;;  %v1821_v30 = vshrl.u32 %v2226_v2, %v1812_v36 }
 0x216   :  { %v1565_v56 = vand.u32 2147483647, %v1564_v3  ;;  %v1824_v14 = vshrl.u32 %v2227_v4, %v1812_v36  ;;  %v1810_v16 = vshrl.u32 %v1809_v37, 5  ;;  %v1817_v40 = vshll.u32 %v2224_v62, %v1811_v25 }
 0x217   :  { %v3441_v29 = vsub.s32 %v1025_v48, %v1028_v1  ;;  %v1820_v61 = vshll.u32 %v2225_v0, %v1811_v25  ;;  %v865_v33 = vshrl.u32 %v864_v43, 23  ;;  %v1816_v34 = vor.u32 %v1815_v49, %v1814_v28 }
 0x218   :  { %v1568_v53 = vmul.f32 %v1567_v46, %v1565_v56  ;;  %v1823_v52 = vshll.u32 %v2226_v2, %v1811_v25  ;;  %v1819_v31 = vor.u32 %v1818_v26, %v1817_v40  ;;  %v1826_v7 = vshll.u32 %v2227_v4, %v1811_v25 }
 0x219   :  { %v1031_v8 = vsub.s32 0, %v3441_v29  ;;  %v1822_v32 = vor.u32 %v1821_v30, %v1820_v61  ;;  %v1827_v39 = vshrl.u32 %v2228_v11, %v1812_v36  ;;  %v3454_v24 = vshll.u32 %v1805_v9, 8 }
 0x21a   :  { %v1569_v35 = vxor.u32 2147483648, %v1568_v53  ;;  %v1825_v44 = vor.u32 %v1824_v14, %v1823_v52  ;;  %v1813_v57 = vshrl.u32 %v2223_v58, %v1812_v36  ;;  %v1975_v55 = vadd.s32 4294967169, %v865_v33 }
 0x21b   :  { %v1980_v59 = vmin.u32 %v1031_v8, %v3441_v29  ;;  %v1828_v10 = vor.u32 %v1827_v39, %v1826_v7  ;;  %vm1829_vm1 = vcmp.lt.s32.totalorder %v1810_v16, 1  ;;  %vm1832_vm2 = vcmp.lt.s32.totalorder %v1810_v16, 4 }
 0x21c   :  { %v1570_v50 = vsel %vm1487_vm4, %v1569_v35, %v1568_v53  ;;  %vm967_vm3 = vcmp.lt.s32.totalorder %v3247_v54, 0  ;;  %vm1830_vm4 = vcmp.lt.s32.totalorder %v1810_v16, 2  ;;  %v1834_v48 = vsel %vm1832_vm2, %v1822_v32, 2102212464 }
 0x21d   :  { %v1573_v19 = vsel %vm3392_vm10, %v3189_v60, %v1570_v50  ;;  %v1033_v21 = vclz %v1980_v59  ;;  %v1837_v15 = vsel %vm1829_vm1, %v1816_v34, %v1819_v31  ;;  %vm1831_vm5 = vcmp.lt.s32.totalorder %v1810_v16, 3 }
 0x21e   :  { %2177 = vcosq.f32 %v1573_v19  ;;  %v1838_v37 = vsel %vm1832_vm2, %v1825_v44, 920167782  ;;  %v1841_v6 = vsel %vm1829_vm1, %v1819_v31, %v1822_v32  ;;  %v1833_v41 = vsel %vm1829_vm1, %v1813_v57, %v1816_v34 }
 0x21f   :  { %2179 = vsinq.f32 %v1573_v19  ;;  %v1981_v20 = vadd.s32 4294967294, %v1033_v21  ;;  %v1839_v13 = vsel %vm1831_vm5, %v1822_v32, %v1838_v37  ;;  %v1842_v42 = vsel %vm1832_vm2, %v1828_v10, 1326507024 }
 0x220   :  { %v871_v45 = vadd.s32 1, %v1975_v55  ;;  %v1835_v25 = vsel %vm1831_vm5, %v1819_v31, %v1834_v48  ;;  %v1840_v3 = vsel %vm1830_vm4, %v1837_v15, %v1839_v13  ;;  %v1843_v9 = vsel %vm1831_vm5, %v1825_v44, %v1842_v42 }
 0x221   :  { %vm1982_vm6 = vcmp.lt.s32.totalorder %v1981_v20, 0  ;;  %v1844_v43 = vsel %vm1830_vm4, %v1841_v6, %v1843_v9  ;;  %v3464_v56 = vmul.u32.u64.low %v3454_v24, %v1840_v3  ;;  %v3465_v46 = vmul.u32.u64.high %v3454_v24, %v1840_v3, %v3464_v56 }
 0x222   :  { %v1036_v36 = vsel %vm1982_vm6, 0, %v1981_v20  ;;  %v1051_v26 = vsub.s32 4, %v3427_v12  ;;  %vm872_vm7 = vcmp.gt.s32.totalorder %v871_v45, 0  ;;  %vm1577_vm9 = vweird.f32 %v3189_v60 }
 0x223   :  { %v1037_v1 = vsub.s32 32, %v1036_v36  ;;  %v1041_v49 = vsub.s32 4294967266, %v1036_v36  ;;  %v1836_v30 = vsel %vm1830_vm4, %v1833_v41, %v1835_v25  ;;  %v873_v14 = vsel %vm872_vm7, %v871_v45, 0 }
 0x224   :  { %v3472_v53 = vmul.u32.u64.low %v3454_v24, %v1844_v43  ;;  %v3473_v28 = vmul.u32.u64.high %v3454_v24, %v1844_v43, %v3472_v53  ;;  %v1038_v40 = vshll.u32 %v3441_v29, %v1036_v36  ;;  %v875_v35 = vand.u32 31, %v873_v14 }
 0x225   :  { %v1039_v61 = vshrl.u32 %v1021_v22, %v1037_v1  ;;  %v1042_v33 = vadd.s32 127, %v1041_v49  ;;  %vm1580_vm8 = vcmp.lt.s32.totalorder %v3429_v27, 2  ;;  %vm1581_vm10 = vcmp.eq.s32.totalorder %v3429_v27, 0 }
 0x226   :  { %vm3480_vm11 = vcmp.le.f32.partialorder %v965_v51, 0.7853982  ;;  %v1855_v16 = vadd.s32 1, %v3465_v46  ;;  %vm1584_vm12 = vcmp.eq.s32.totalorder %v3429_v27, 2  ;;  %v1052_v22 = vsel %vm967_vm3, %v1051_v26, %v3427_v12 }
 0x227   :  { %v1040_v52 = vor.u32 %v1039_v61, %v1038_v40  ;;  %v1043_v29 = vshll.u32 %v1042_v33, 23  ;;  %v1852_v7 = vmul.u32 %v3454_v24, %v1836_v30  ;;  %vm1854_vm13 = vc.u32 %v3473_v28, %v3464_v56 }
 0x228   :  { %v2178_v34 = vpop.eup %2177  ;;  %v876_v51 = vsub.s32 32, %v875_v35  ;;  %v1856_v59 = vsel %vm1854_vm13, %v1855_v16, %v3465_v46  ;;  %v869_v44 = vor.u32 8388608, %v3435_v17  ;;  %v1054_v57 = vsel %vm3480_vm11, 0, %v1052_v22 }
 0x229   :  { %v2180_v31 = vpop.eup %2179  ;;  %v1585_v32 = vxor.u32 2147483648, %v2178_v34  ;;  %v1044_v50 = vor.u32 4788187, %v1043_v29  ;;  %v1857_v10 = vadd.s32 %v1856_v59, %v1852_v7  ;;  %v3498_v12 = vadd.f32 %v3340_v18, %v3056_v5 }
 0x22a   :  { %v1582_v39 = vxor.u32 2147483648, %v2180_v31  ;;  %v1047_v21 = vcvt.s32.f32 %v1040_v52  ;;  %v874_v48 = vshrl.u32 %v873_v14, 5  ;;  %v879_v17 = vshrl.u32 %v2224_v62, %v876_v51 }
 0x22b   :  { %v1586_v19 = vsel %vm1584_vm12, %v1585_v32, %v2180_v31  ;;  %v1045_v55 = vand.u32 2147483647, %v1044_v50  ;;  %v1858_v20 = vadd.s32 536870912, %v1857_v10  ;;  %v882_v37 = vshrl.u32 %v2225_v0, %v876_v51 }
 0x22c   :  { %v1583_v24 = vsel %vm1581_vm10, %v2178_v34, %v1582_v39  ;;  %v878_v5 = vshll.u32 %v2223_v58, %v875_v35  ;;  %v885_v18 = vshrl.u32 %v2226_v2, %v876_v51  ;;  %v881_v42 = vshll.u32 %v2224_v62, %v875_v35 }
 0x22d   :  { %v1587_v15 = vsel %vm1580_vm8, %v1583_v24, %v1586_v19  ;;  %v1048_v41 = vmul.f32 %v1047_v21, %v1045_v55  ;;  %v3510_v13 = vshrl.u32 %v1858_v20, 30  ;;  %v884_v27 = vshll.u32 %v2225_v0, %v875_v35 }
 0x22e   :  { %v1588_v6 = vsel %vm1577_vm9, nan, %v1587_v15  ;;  %v888_v45 = vshrl.u32 %v2227_v4, %v876_v51  ;;  %v887_v3 = vshll.u32 %v2226_v2, %v875_v35  ;;  %v890_v60 = vshll.u32 %v2227_v4, %v875_v35 }
 0x22f   :  { %1913 = vst [vmem:[#allocation2 + $0x60] sm:$0xff] %v1588_v6  ;;  %v1049_v25 = vxor.u32 2147483648, %v1048_v41  ;;  %v891_v9 = vshrl.u32 %v2228_v11, %v876_v51  ;;  %v1860_v36 = vshll.u32 %v3510_v13, 30  ;;  %v880_v43 = vor.u32 %v879_v17, %v878_v5 }
 0x230   :  { %v883_v46 = vor.u32 %v882_v37, %v881_v42  ;;  %v3519_v1 = vshll.u32 %v869_v44, 8  ;;  %v886_v26 = vor.u32 %v885_v18, %v884_v27  ;;  %v889_v30 = vor.u32 %v888_v45, %v887_v3 }
 0x231   :  { %v1050_v49 = vsel %vm967_vm3, %v1049_v25, %v1048_v41  ;;  %v892_v53 = vor.u32 %v891_v9, %v890_v60  ;;  %v1058_v40 = vadd.s32 3, %v1054_v57  ;;  %v1861_v61 = vsub.s32 %v1857_v10, %v1860_v36 }
 0x232   :  { %v1053_v14 = vsel %vm3480_vm11, %v3247_v54, %v1050_v49  ;;  %v1696_v33 = vand.u32 2139095040, %v3498_v12  ;;  %v877_v35 = vshrl.u32 %v2223_v58, %v876_v51  ;;  %vm893_vm14 = vcmp.lt.s32.totalorder %v874_v48, 1 }
 0x233   :  { %2181 = vcosq.f32 %v1053_v14  ;;  %vm895_vm15 = vcmp.lt.s32.totalorder %v874_v48, 3  ;;  %v1863_v16 = vsub.s32 0, %v1861_v61  ;;  %vm896_vm0 = vcmp.lt.s32.totalorder %v874_v48, 4 }
 0x234   :  { %2183 = vsinq.f32 %v1053_v14  ;;  %v901_v34 = vsel %vm893_vm14, %v880_v43, %v883_v46  ;;  %v898_v52 = vsel %vm896_vm0, %v886_v26, 2102212464  ;;  %v902_v29 = vsel %vm896_vm0, %v889_v30, 920167782 }
 0x235   :  { %v905_v22 = vsel %vm893_vm14, %v883_v46, %v886_v26  ;;  %v906_v8 = vsel %vm896_vm0, %v892_v53, 1326507024  ;;  %v2012_v31 = vmin.u32 %v1863_v16, %v1861_v61  ;;  %vm894_vm1 = vcmp.lt.s32.totalorder %v874_v48, 2 }
 0x236   :  { %v903_v32 = vsel %vm895_vm15, %v886_v26, %v902_v29  ;;  %v907_v7 = vsel %vm895_vm15, %v889_v30, %v906_v8  ;;  %v1059_v39 = vand.u32 3, %v1058_v40  ;;  %v1697_v59 = vshrl.u32 %v1696_v33, 23 }
 0x237   :  { %v904_v51 = vsel %vm894_vm1, %v901_v34, %v903_v32  ;;  %v908_v50 = vsel %vm894_vm1, %v905_v22, %v907_v7  ;;  %v1865_v44 = vclz %v2012_v31  ;;  %v897_v19 = vsel %vm893_vm14, %v877_v35, %v880_v43 }
 0x238   :  { %v899_v57 = vsel %vm895_vm15, %v883_v46, %v898_v52  ;;  %v3537_v10 = vmul.u32.u64.low %v3519_v1, %v908_v50  ;;  %v3538_v24 = vmul.u32.u64.high %v3519_v1, %v908_v50, %v3537_v10  ;;  %v2007_v20 = vadd.s32 4294967169, %v1697_v59 }
 0x239   :  { %v3541_v55 = vmul.u32.u64.low %v3519_v1, %v904_v51  ;;  %v3542_v21 = vmul.u32.u64.high %v3519_v1, %v904_v51, %v3541_v55  ;;  %v2013_v15 = vadd.s32 4294967294, %v1865_v44  ;;  %vm1057_vm2 = vweird.f32 %v3247_v54 }
 0x23a   :  { %vm1061_vm3 = vcmp.eq.s32.totalorder %v1059_v39, 0  ;;  %v900_v17 = vsel %vm894_vm1, %v897_v19, %v899_v57  ;;  %vm1064_vm4 = vcmp.eq.s32.totalorder %v1059_v39, 2  ;;  %v1853_v37 = vadd.s32 %v3464_v56, %v3473_v28 }
 0x23b   :  { %vm2014_vm5 = vcmp.lt.s32.totalorder %v2013_v15, 0  ;;  %v1703_v6 = vadd.s32 1, %v2007_v20  ;;  %v1883_v18 = vsub.s32 4, %v3510_v13  ;;  %vm918_vm6 = vc.u32 %v3538_v24, %v3541_v55 }
 0x23c   :  { %v1868_v5 = vsel %vm2014_vm5, 0, %v2013_v15  ;;  %v919_v42 = vadd.s32 1, %v3542_v21  ;;  %v916_v3 = vmul.u32 %v3519_v1, %v900_v17  ;;  %vm1060_vm9 = vcmp.lt.s32.totalorder %v1059_v39, 2 }
 0x23d   :  { %v2182_v41 = vpop.eup %2181  ;;  %v1869_v25 = vsub.s32 32, %v1868_v5  ;;  %v1873_v48 = vsub.s32 4294967266, %v1868_v5  ;;  %v1870_v9 = vshll.u32 %v1861_v61, %v1868_v5  ;;  %vm1704_vm7 = vcmp.gt.s32.totalorder %v1703_v6, 0 }
 0x23e   :  { %v2184_v27 = vpop.eup %2183  ;;  %v1065_v45 = vxor.u32 2147483648, %v2182_v41  ;;  %v920_v56 = vsel %vm918_vm6, %v919_v42, %v3542_v21  ;;  %v1693_v26 = vand.u32 2147483647, %v3498_v12  ;;  %v1705_v30 = vsel %vm1704_vm7, %v1703_v6, 0 }
 0x23f   :  { %v1062_v60 = vxor.u32 2147483648, %v2184_v27  ;;  %v1871_v36 = vshrl.u32 %v1853_v37, %v1869_v25  ;;  %v1874_v43 = vadd.s32 127, %v1873_v48  ;;  %v921_v46 = vadd.s32 %v920_v56, %v916_v3 }
 0x240   :  { %v1066_v28 = vsel %vm1064_vm4, %v1065_v45, %v2184_v27  ;;  %vm1799_vm8 = vcmp.lt.s32.totalorder %v3344_v63, 0  ;;  %v1707_v33 = vand.u32 31, %v1705_v30  ;;  %v1700_v52 = vand.u32 8388607, %v1693_v26 }
 0x241   :  { %v1063_v49 = vsel %vm1061_vm3, %v2182_v41, %v1062_v60  ;;  %v1872_v14 = vor.u32 %v1871_v36, %v1870_v9  ;;  %v1875_v40 = vshll.u32 %v1874_v43, 23  ;;  %v922_v1 = vadd.s32 536870912, %v921_v46 }
 0x242   :  { %v1067_v53 = vsel %vm1060_vm9, %v1063_v49, %v1066_v28  ;;  %v1884_v16 = vsel %vm1799_vm8, %v1883_v18, %v3510_v13  ;;  %v1708_v29 = vsub.s32 32, %v1707_v33  ;;  %vm3570_vm10 = vcmp.le.f32.partialorder %v1797_v38, 0.7853982 }
 0x243   :  { %v1068_v61 = vsel %vm1057_vm2, nan, %v1067_v53  ;;  %v1876_v35 = vor.u32 4788187, %v1875_v40  ;;  %v3564_v34 = vshrl.u32 %v922_v1, 30  ;;  %v1879_v8 = vcvt.s32.f32 %v1872_v14 }
 0x244   :  { %1908 = vst [vmem:[#allocation2 + $0x38] sm:$0xff] %v1068_v61  ;;  %v1886_v32 = vsel %vm3570_vm10, 0, %v1884_v16  ;;  %v1711_v13 = vshrl.u32 %v2224_v62, %v1708_v29  ;;  %v1714_v7 = vshrl.u32 %v2225_v0, %v1708_v29  ;;  %v1717_v39 = vshrl.u32 %v2226_v2, %v1708_v29 }
 0x245   :  { %v1877_v22 = vand.u32 2147483647, %v1876_v35  ;;  %v924_v31 = vshll.u32 %v3564_v34, 30  ;;  %v1710_v38 = vshll.u32 %v2223_v58, %v1707_v33  ;;  %v1720_v59 = vshrl.u32 %v2227_v4, %v1708_v29 }
 0x246   :  { %v1701_v44 = vor.u32 8388608, %v1700_v52  ;;  %v1706_v19 = vshrl.u32 %v1705_v30, 5  ;;  %v1713_v57 = vshll.u32 %v2224_v62, %v1707_v33  ;;  %v1716_v10 = vshll.u32 %v2225_v0, %v1707_v33 }
 0x247   :  { %v1880_v51 = vmul.f32 %v1879_v8, %v1877_v22  ;;  %v925_v50 = vsub.s32 %v921_v46, %v924_v31  ;;  %v1712_v20 = vor.u32 %v1711_v13, %v1710_v38  ;;  %v1719_v17 = vshll.u32 %v2226_v2, %v1707_v33 }
 0x248   :  { %v1715_v37 = vor.u32 %v1714_v7, %v1713_v57  ;;  %v1718_v6 = vor.u32 %v1717_v39, %v1716_v10  ;;  %v1722_v41 = vshll.u32 %v2227_v4, %v1707_v33  ;;  %v1723_v5 = vshrl.u32 %v2228_v11, %v1708_v29 }
 0x249   :  { %v1881_v21 = vxor.u32 2147483648, %v1880_v51  ;;  %v927_v15 = vsub.s32 0, %v925_v50  ;;  %v1721_v27 = vor.u32 %v1720_v59, %v1719_v17  ;;  %v1890_v0 = vadd.s32 3, %v1886_v32 }
 0x24a   :  { %v1724_v45 = vor.u32 %v1723_v5, %v1722_v41  ;;  %v1741_v25 = vshll.u32 %v1701_v44, 8  ;;  %vm1725_vm11 = vcmp.lt.s32.totalorder %v1706_v19, 1  ;;  %vm1728_vm12 = vcmp.lt.s32.totalorder %v1706_v19, 4 }
 0x24b   :  { %v1882_v18 = vsel %vm1799_vm8, %v1881_v21, %v1880_v51  ;;  %v1976_v42 = vmin.u32 %v927_v15, %v925_v50  ;;  %v1709_v4 = vshrl.u32 %v2223_v58, %v1708_v29  ;;  %v1730_v11 = vsel %vm1728_vm12, %v1718_v6, 2102212464 }
 0x24c   :  { %v1885_v62 = vsel %vm3570_vm10, %v3344_v63, %v1882_v18  ;;  %v1733_v48 = vsel %vm1725_vm11, %v1712_v20, %v1715_v37  ;;  %vm1727_vm13 = vcmp.lt.s32.totalorder %v1706_v19, 3  ;;  %v1734_v60 = vsel %vm1728_vm12, %v1721_v27, 920167782 }
 0x24d   :  { %2185 = vcosq.f32 %v1885_v62  ;;  %v929_v2 = vclz %v1976_v42  ;;  %v1737_v9 = vsel %vm1725_vm11, %v1715_v37, %v1718_v6  ;;  %vm1726_vm14 = vcmp.lt.s32.totalorder %v1706_v19, 2 }
 0x24e   :  { %2187 = vsinq.f32 %v1885_v62  ;;  %v1729_v56 = vsel %vm1725_vm11, %v1709_v4, %v1712_v20  ;;  %v1735_v28 = vsel %vm1727_vm13, %v1718_v6, %v1734_v60  ;;  %v1738_v36 = vsel %vm1728_vm12, %v1724_v45, 1326507024 }
 0x24f   :  { %v1977_v3 = vadd.s32 4294967294, %v929_v2  ;;  %v1731_v43 = vsel %vm1727_vm13, %v1715_v37, %v1730_v11  ;;  %v1736_v46 = vsel %vm1726_vm14, %v1733_v48, %v1735_v28  ;;  %v1739_v49 = vsel %vm1727_vm13, %v1721_v27, %v1738_v36 }
 0x250   :  { %v1740_v53 = vsel %vm1726_vm14, %v1737_v9, %v1739_v49  ;;  %v3595_v14 = vmul.u32.u64.low %v1741_v25, %v1736_v46  ;;  %v3596_v58 = vmul.u32.u64.high %v1741_v25, %v1736_v46, %v3595_v14  ;;  %v917_v40 = vadd.s32 %v3541_v55, %v3538_v24 }
 0x251   :  { %vm1978_vm15 = vcmp.lt.s32.totalorder %v1977_v3, 0  ;;  %v1891_v33 = vand.u32 3, %v1890_v0  ;;  %v3600_v35 = vmul.u32.u64.low %v1741_v25, %v1740_v53  ;;  %v3601_v16 = vmul.u32.u64.high %v1741_v25, %v1740_v53, %v3600_v35 }
 0x252   :  { %v932_v30 = vsel %vm1978_vm15, 0, %v1977_v3  ;;  %v1732_v22 = vsel %vm1726_vm14, %v1729_v56, %v1731_v43  ;;  %v1751_v8 = vadd.s32 1, %v3596_v58  ;;  %vm1889_vm4 = vweird.f32 %v3344_v63 }
 0x253   :  { %v933_v1 = vsub.s32 32, %v932_v30  ;;  %v937_v61 = vsub.s32 4294967266, %v932_v30  ;;  %v934_v52 = vshll.u32 %v925_v50, %v932_v30  ;;  %v1748_v51 = vmul.u32 %v1741_v25, %v1732_v22 }
 0x254   :  { %vm1750_vm0 = vc.u32 %v3601_v16, %v3595_v14  ;;  %vm1896_vm1 = vcmp.eq.s32.totalorder %v1891_v33, 2  ;;  %vm1893_vm2 = vcmp.eq.s32.totalorder %v1891_v33, 0  ;;  %vm1892_vm3 = vcmp.lt.s32.totalorder %v1891_v33, 2 }
 0x255   :  { %v935_v29 = vshrl.u32 %v917_v40, %v933_v1  ;;  %v938_v54 = vadd.s32 127, %v937_v61  ;;  %v1752_v38 = vsel %vm1750_vm0, %v1751_v8, %v3596_v58  ;;  %v947_v17 = vsub.s32 4, %v3564_v34 }
 0x256   :  { %v1753_v59 = vadd.s32 %v1752_v38, %v1748_v51  ;;  %vm863_vm5 = vcmp.lt.s32.totalorder %v3405_v47, 0  ;;  %vm862_vm6 = vcmp.le.f32.partialorder %v861_v23, 0.7853982  ;;  %v1749_v60 = vadd.s32 %v3595_v14, %v3601_v16 }
 0x257   :  { %v2186_v31 = vpop.eup %2185  ;;  %v936_v32 = vor.u32 %v935_v29, %v934_v52  ;;  %v939_v13 = vshll.u32 %v938_v54, 23  ;;  %v948_v18 = vsel %vm863_vm5, %v947_v17, %v3564_v34  ;;  %vm953_vm11 = vweird.f32 %v3405_v47 }
 0x258   :  { %v2188_v7 = vpop.eup %2187  ;;  %v1897_v39 = vxor.u32 2147483648, %v2186_v31  ;;  %v1754_v21 = vadd.s32 536870912, %v1753_v59  ;;  %v950_v27 = vsel %vm862_vm6, 0, %v948_v18  ;;  %vm1695_vm12 = vcmp.lt.s32.totalorder %v3498_v12, 0 }
 0x259   :  { %v1894_v24 = vxor.u32 2147483648, %v2188_v7  ;;  %v940_v55 = vor.u32 4788187, %v939_v13  ;;  %v943_v57 = vcvt.s32.f32 %v936_v32  ;;  %v954_v45 = vadd.s32 3, %v950_v27 }
 0x25a   :  { %v1898_v50 = vsel %vm1896_vm1, %v1897_v39, %v2188_v7  ;;  %v1755_v37 = vshrl.u32 %v1754_v21, 30  ;;  %vm1694_vm13 = vcmp.le.f32.partialorder %v1693_v26, 0.7853982  ;;  %vm1785_vm1 = vweird.f32 %v3498_v12 }
 0x25b   :  { %v1895_v44 = vsel %vm1893_vm2, %v2186_v31, %v1894_v24  ;;  %v941_v19 = vand.u32 2147483647, %v940_v55  ;;  %v955_v4 = vand.u32 3, %v954_v45 }
 0x25c   :  { %v1899_v10 = vsel %vm1892_vm3, %v1895_v44, %v1898_v50  ;;  %v1756_v41 = vshll.u32 %v1755_v37, 30  ;;  %v1779_v35 = vsub.s32 4, %v1755_v37 }
 0x25d   :  { %v1900_v15 = vsel %vm1889_vm4, nan, %v1899_v10  ;;  %v944_v20 = vmul.f32 %v943_v57, %v941_v19  ;;  %vm957_vm9 = vcmp.eq.s32.totalorder %v955_v4, 0  ;;  %vm960_vm8 = vcmp.eq.s32.totalorder %v955_v4, 2 }
 0x25e   :  { %1916 = vst [vmem:[#allocation2 + $0x78] sm:$0xff] %v1900_v15  ;;  %v1757_v42 = vsub.s32 %v1753_v59, %v1756_v41  ;;  %vm956_vm10 = vcmp.lt.s32.totalorder %v955_v4, 2  ;;  %v1780_v29 = vsel %vm1695_vm12, %v1779_v35, %v1755_v37 }
 0x25f   :  { %v945_v6 = vxor.u32 2147483648, %v944_v20  ;;  %v1782_v54 = vsel %vm1694_vm13, 0, %v1780_v29 }
 0x260   :  { %v1759_v62 = vsub.s32 0, %v1757_v42  ;;  %v1786_v22 = vadd.s32 3, %v1782_v54 }
 0x261   :  { %v946_v5 = vsel %vm863_vm5, %v945_v6, %v944_v20 }
 0x262   :  { %v949_v63 = vsel %vm862_vm6, %v3405_v47, %v946_v5  ;;  %v2008_v0 = vmin.u32 %v1759_v62, %v1757_v42  ;;  %v1787_v8 = vand.u32 3, %v1786_v22 }
 0x263   :  { %2189 = vcosq.f32 %v949_v63 }
 0x264   :  { %2191 = vsinq.f32 %v949_v63  ;;  %v1761_v25 = vclz %v2008_v0  ;;  %vm1792_vm14 = vcmp.eq.s32.totalorder %v1787_v8, 2  ;;  %vm1789_vm15 = vcmp.eq.s32.totalorder %v1787_v8, 0 }
 0x265   :  { %vm1788_vm0 = vcmp.lt.s32.totalorder %v1787_v8, 2 }
 0x266   :  { %v2009_v2 = vadd.s32 4294967294, %v1761_v25 }
 0x268   :  { %vm2010_vm7 = vcmp.lt.s32.totalorder %v2009_v2, 0 }
 0x269   :  { %v1764_v48 = vsel %vm2010_vm7, 0, %v2009_v2 }
 0x26a   :  { %v1765_v34 = vsub.s32 32, %v1764_v48  ;;  %v1769_v9 = vsub.s32 4294967266, %v1764_v48  ;;  %v1766_v36 = vshll.u32 %v1757_v42, %v1764_v48 }
 0x26c   :  { %v1767_v43 = vshrl.u32 %v1749_v60, %v1765_v34  ;;  %v1770_v46 = vadd.s32 127, %v1769_v9 }
 0x26d   :  { %v2190_v11 = vpop.eup %2189 }
 0x26e   :  { %v2192_v3 = vpop.eup %2191  ;;  %v961_v23 = vxor.u32 2147483648, %v2190_v11  ;;  %v1768_v53 = vor.u32 %v1767_v43, %v1766_v36  ;;  %v1771_v58 = vshll.u32 %v1770_v46, 23 }
 0x26f   :  { %v958_v56 = vxor.u32 2147483648, %v2192_v3 }
 0x270   :  { %v962_v28 = vsel %vm960_vm8, %v961_v23, %v2192_v3  ;;  %v1772_v1 = vor.u32 4788187, %v1771_v58  ;;  %v1775_v61 = vcvt.s32.f32 %v1768_v53 }
 0x271   :  { %v959_v49 = vsel %vm957_vm9, %v2190_v11, %v958_v56 }
 0x272   :  { %v963_v30 = vsel %vm956_vm10, %v959_v49, %v962_v28  ;;  %v1773_v14 = vand.u32 2147483647, %v1772_v1 }
 0x273   :  { %v964_v40 = vsel %vm953_vm11, nan, %v963_v30 }
 0x274   :  { %1907 = vst [vmem:[#allocation2 + $0x30] sm:$0xff] %v964_v40  ;;  %v1776_v33 = vmul.f32 %v1775_v61, %v1773_v14 }
 0x276   :  { %v1777_v16 = vxor.u32 2147483648, %v1776_v33 }
 0x278   :  { %v1778_v52 = vsel %vm1695_vm12, %v1777_v16, %v1776_v33 }
 0x279   :  { %v1781_v47 = vsel %vm1694_vm13, %v3498_v12, %v1778_v52 }
 0x27a   :  { %2193 = vcosq.f32 %v1781_v47 }
 0x27b   :  { %2195 = vsinq.f32 %v1781_v47 }
 0x284   :  { %v2194_v31 = vpop.eup %2193 }
 0x285   :  { %v2196_v32 = vpop.eup %2195  ;;  %v1793_v13 = vxor.u32 2147483648, %v2194_v31 }
 0x286   :  { %v1790_v7 = vxor.u32 2147483648, %v2196_v32 }
 0x287   :  { %v1794_v39 = vsel %vm1792_vm14, %v1793_v13, %v2196_v32 }
 0x288   :  { %v1791_v26 = vsel %vm1789_vm15, %v2194_v31, %v1790_v7 }
 0x289   :  { %v1795_v51 = vsel %vm1788_vm0, %v1791_v26, %v1794_v39 }
 0x28a   :  { %v1796_v24 = vsel %vm1785_vm1, nan, %v1795_v51 }
 0x28b   :  { %1915 = vst [vmem:[#allocation2 + $0x70] sm:$0xff] %v1796_v24 }
 0x28c   :  { %2210 = shalt.err (!%p2207_p4)
}
 0x28d   :  { %s2211_s26 = scalar_lea.hbm %s3636_s3, 2048 }
 0x28e   :  { %p2212_p5 = scmp.ne.s32.totalorder %s3636_s3, %s2211_s26  ;;  %p2215_p6 = scmp.lt.u32.totalorder %s2211_s26, %s3636_s3 }
 0x290   :  { %p2217_p7 = pnand %p2215_p6, %p2212_p5 }
 0x292   :  { %2220 = shalt.err (!%p2217_p7)
}
 0x293   :  { %s2230_s4 = smov 128   ;;  %s2231_s5 = smov 8  }
 0x294   :  { %1928 = dma.vmem_to_hbm [thread:$0]  %s1923_s22, 2048, %s3636_s3, [#allocation3], %s2230_s4, %s2230_s4, %s2231_s5  }
 0x295   :  { %2221 = dma.done.wait [#allocation3], 2048  }
 0x296   :  { %2222 = vsyncadd [#allocation3], 4294965248 }
 0x297   :  { %1932 = vsyncpa [#allocation3], 1 }

</bundles_post_ra>
